<compile_context>
chip_gen: v5e
topology: v5e:2x2
jax: 0.10.0
libtpu: 0.0.40
codegen_flags: <defaults>
</compile_context>

<pallas_src>
import functools
import math

import jax
import jax.numpy as jnp
from jax.experimental import pallas as pl
from jax.experimental.pallas import tpu as pltpu

LN_EPS = 1e-5                   # PyTorch nn.LayerNorm default
MATMUL_DTYPE = jnp.bfloat16     # MXU operand dtype; accumulation is always f32

LN_FUSE_MAX_N = 1024            # fuse add+LN into the matmul epilogue if N <= this
LN_TM = 512                     # row tile for the (fallback) standalone add+LN
ATTN_Q_TILE = 256               # flash-attention query tile
ATTN_KV_TILE = 512              # flash-attention key/value tile


def _select_matmul_tiles():
    """Chip-dependent matmul tiles (TM, TN, TK)."""
    try:
        kind = jax.devices()[0].device_kind.lower()
    except Exception:  # pragma: no cover - CPU fallback for tracing
        kind = ""
    if "v5 lite" in kind or "v5e" in kind or "v5lite" in kind:
        # v5e: 4x128^2 MXU, single vector-store slot -> 128-wide output tiles.
        return 256, 128, 256
    if "v6" in kind:
        # v6e: 128 MiB VMEM -> bigger tiles cut per-step overhead, raise K reuse.
        return 512, 256, 512
    # v7x & default: budgeted against 64 MiB physical / 32 MiB scoped VMEM.
    return 256, 256, 512


TM, TN, TK = _select_matmul_tiles()


def _round_up(x, m):
    return (x + m - 1) // m * m


def _tile_and_pad(dim, target):
    """(tile, padded_extent): full-dim block if it fits, else `target`-multiple."""
    if dim <= target:
        return dim, dim
    return target, _round_up(dim, target)


def _pad2d(a, rows, cols):
    r, c = a.shape
    if r == rows and c == cols:
        return a
    return jnp.pad(a, ((0, rows - r), (0, cols - c)))


# ----------------------------- Pallas kernels ------------------------------ #

def _matmul_bias_kernel(x_ref, w_ref, b_ref, o_ref, acc_ref, *, activation):
    """Tiled  act(x @ w + b)  with f32 accumulation over the k grid axis."""
    @pl.when(pl.program_id(2) == 0)
    def _init():
        acc_ref[...] = jnp.zeros_like(acc_ref)

    # Cast operands to bf16 in-kernel (no-op when already bf16).
    acc_ref[...] += jnp.dot(x_ref[...].astype(MATMUL_DTYPE),
                            w_ref[...].astype(MATMUL_DTYPE),
                            preferred_element_type=jnp.float32)

    @pl.when(pl.program_id(2) == pl.num_programs(2) - 1)
    def _epilogue():                      # bias + activation + single store
        out = acc_ref[...] + b_ref[...]
        if activation == "relu":
            out = jnp.maximum(out, 0.0)
        o_ref[...] = out.astype(o_ref.dtype)


def pallas_linear(x, w, b, activation=None, out_dtype=jnp.float32):
    """y = act(x @ w + b).  x: (M, K), w: (K, N) bf16, b: (1, N) f32."""
    M, K = x.shape
    N = w.shape[1]
    tm, Mp = _tile_and_pad(M, TM)
    tn, Np = _tile_and_pad(N, TN)
    tk, Kp = _tile_and_pad(K, TK)

    xp = _pad2d(x, Mp, Kp)          # no-op when dims already fit one tile
    wp = _pad2d(w, Kp, Np)
    bp = _pad2d(b, 1, Np)

    out = pl.pallas_call(
        functools.partial(_matmul_bias_kernel, activation=activation),
        out_shape=jax.ShapeDtypeStruct((Mp, Np), out_dtype),
        grid=(Mp // tm, Np // tn, Kp // tk),
        in_specs=[
            pl.BlockSpec((tm, tk), lambda i, j, k: (i, k)),
            pl.BlockSpec((tk, tn), lambda i, j, k: (k, j)),
            pl.BlockSpec((1, tn), lambda i, j, k: (0, j)),
        ],
        out_specs=pl.BlockSpec((tm, tn), lambda i, j, k: (i, j)),
        scratch_shapes=[pltpu.VMEM((tm, tn), jnp.float32)],
        compiler_params=pltpu.CompilerParams(
            dimension_semantics=("parallel", "parallel", "arbitrary")),
    )(xp, wp, bp)
    if Mp != M or Np != N:
        out = out[:M, :N]
    return out


def _matmul_add_ln_kernel(x_ref, w_ref, b_ref, res_ref, g_ref, beta_ref,
                          o_ref, acc_ref):
    """Tiled  LayerNorm(res + x @ w + b)  (full N row resident in one tile)."""
    @pl.when(pl.program_id(1) == 0)
    def _init():
        acc_ref[...] = jnp.zeros_like(acc_ref)

    acc_ref[...] += jnp.dot(x_ref[...].astype(MATMUL_DTYPE),
                            w_ref[...].astype(MATMUL_DTYPE),
                            preferred_element_type=jnp.float32)

    @pl.when(pl.program_id(1) == pl.num_programs(1) - 1)
    def _epilogue():
        z = acc_ref[...] + b_ref[...] + res_ref[...].astype(jnp.float32)
        mu = jnp.mean(z, axis=-1, keepdims=True)
        var = jnp.mean(jnp.square(z - mu), axis=-1, keepdims=True)
        o_ref[...] = ((z - mu) * jax.lax.rsqrt(var + LN_EPS) * g_ref[...]
                      + beta_ref[...]).astype(o_ref.dtype)


def pallas_linear_add_layernorm(x, w, b, residual, gamma, beta,
                                out_dtype=jnp.float32):
    """LayerNorm(residual + x @ w + b).  Requires N == w.shape[1] in one tile."""
    M, K = x.shape
    N = w.shape[1]
    tm, Mp = _tile_and_pad(M, TM)
    tk, Kp = _tile_and_pad(K, TK)
    xp = _pad2d(x, Mp, Kp)
    wp = _pad2d(w, Kp, N)
    rp = _pad2d(residual, Mp, N)

    out = pl.pallas_call(
        _matmul_add_ln_kernel,
        out_shape=jax.ShapeDtypeStruct((Mp, N), out_dtype),
        grid=(Mp // tm, Kp // tk),
        in_specs=[
            pl.BlockSpec((tm, tk), lambda i, k: (i, k)),
            pl.BlockSpec((tk, N), lambda i, k: (k, 0)),
            pl.BlockSpec((1, N), lambda i, k: (0, 0)),
            pl.BlockSpec((tm, N), lambda i, k: (i, 0)),
            pl.BlockSpec((1, N), lambda i, k: (0, 0)),
            pl.BlockSpec((1, N), lambda i, k: (0, 0)),
        ],
        out_specs=pl.BlockSpec((tm, N), lambda i, k: (i, 0)),
        scratch_shapes=[pltpu.VMEM((tm, N), jnp.float32)],
        compiler_params=pltpu.CompilerParams(
            dimension_semantics=("parallel", "arbitrary")),
    )(xp, wp, b, rp, gamma, beta)
    if Mp != M:
        out = out[:M]
    return out


def _add_ln_kernel(x_ref, y_ref, g_ref, b_ref, o_ref):
    z = x_ref[...].astype(jnp.float32) + y_ref[...].astype(jnp.float32)
    mu = jnp.mean(z, axis=-1, keepdims=True)
    var = jnp.mean(jnp.square(z - mu), axis=-1, keepdims=True)
    o_ref[...] = ((z - mu) * jax.lax.rsqrt(var + LN_EPS) * g_ref[...]
                  + b_ref[...]).astype(o_ref.dtype)


def pallas_add_layernorm(x, y, gamma, beta):
    """Fallback standalone LayerNorm(x + y), row tiled.  x, y: (M, D)."""
    M, D = x.shape
    tm, Mp = _tile_and_pad(M, LN_TM)
    xp = _pad2d(x, Mp, D)
    yp = _pad2d(y, Mp, D)
    out = pl.pallas_call(
        _add_ln_kernel,
        out_shape=jax.ShapeDtypeStruct((Mp, D), jnp.float32),
        grid=(Mp // tm,),
        in_specs=[
            pl.BlockSpec((tm, D), lambda i: (i, 0)),
            pl.BlockSpec((tm, D), lambda i: (i, 0)),
            pl.BlockSpec((1, D), lambda i: (0, 0)),
            pl.BlockSpec((1, D), lambda i: (0, 0)),
        ],
        out_specs=pl.BlockSpec((tm, D), lambda i: (i, 0)),
        compiler_params=pltpu.CompilerParams(dimension_semantics=("parallel",)),
    )(xp, yp, gamma, beta)
    if Mp != M:
        out = out[:M]
    return out


def linear_residual_ln(x, w, b, residual, gamma, beta):
    """LayerNorm(residual + x @ w + b) — fused epilogue when the row fits one tile."""
    if w.shape[1] <= LN_FUSE_MAX_N:
        return pallas_linear_add_layernorm(x, w, b, residual, gamma, beta)
    h = pallas_linear(x, w, b)
    return pallas_add_layernorm(residual, h, gamma, beta)


def _flash_mha_kernel(q_ref, k_ref, v_ref, o_ref, m_sc, l_sc, acc_sc,
                      *, num_heads, scale):
    """Online-softmax multi-head SDPA; grid = (batch, q tiles, kv tiles)."""
    kv_idx = pl.program_id(2)

    @pl.when(kv_idx == 0)
    def _init():
        m_sc[...] = jnp.full_like(m_sc, -jnp.inf)
        l_sc[...] = jnp.zeros_like(l_sc)
        acc_sc[...] = jnp.zeros_like(acc_sc)

    E = o_ref.shape[-1]
    dh = E // num_heads
    # TODO(synk): when head_dim is a multiple of 128, lane-align heads / use a
    # batched dot_general so the 256-deep MXU sees full-depth contractions.
    for h in range(num_heads):                       # statically unrolled
        sl = slice(h * dh, (h + 1) * dh)
        qh = q_ref[0, :, sl]                         # (tq, dh)  bf16
        kh = k_ref[0, :, sl]                         # (tkv, dh)
        vh = v_ref[0, :, sl]                         # (tkv, dh)
        s = jax.lax.dot_general(qh, kh, (((1,), (1,)), ((), ())),
                                preferred_element_type=jnp.float32) * scale
        m_prev = m_sc[:, h:h + 1]                    # (tq, 1)
        l_prev = l_sc[:, h:h + 1]
        m_new = jnp.maximum(m_prev, jnp.max(s, axis=-1, keepdims=True))
        alpha = jnp.exp(m_prev - m_new)
        p = jnp.exp(s - m_new)
        l_sc[:, h:h + 1] = alpha * l_prev + jnp.sum(p, axis=-1, keepdims=True)
        m_sc[:, h:h + 1] = m_new
        acc_sc[:, sl] = alpha * acc_sc[:, sl] + jnp.dot(
            p.astype(vh.dtype), vh, preferred_element_type=jnp.float32)

    @pl.when(kv_idx == pl.num_programs(2) - 1)
    def _finalize():
        inv_l = pl.reciprocal(l_sc[...], approx=True)     # (tq, H) on the EUP
        for h in range(num_heads):                        # direct per-head store
            sl = slice(h * dh, (h + 1) * dh)
            o_ref[0, :, sl] = (acc_sc[:, sl] * inv_l[:, h:h + 1]).astype(o_ref.dtype)


def pallas_flash_attention(q_arr, k_arr, v_arr, q_col, k_col, v_col,
                           L, S, E, num_heads, out_dtype=MATMUL_DTYPE):
    """Flash-style attention.  q/k/v blocks are E-wide column blocks (index
    q_col/k_col/v_col) of the given arrays, so packed QKV / KV projection
    outputs can be consumed directly without host-side slicing."""
    B = q_arr.shape[0]
    scale = 1.0 / math.sqrt(E // num_heads)
    tq = ATTN_Q_TILE if L % ATTN_Q_TILE == 0 else L
    tkv = ATTN_KV_TILE if S % ATTN_KV_TILE == 0 else S
    # TODO(synk): pad + mask the KV axis for very long sequences that are not a
    # multiple of the KV tile (softmax currently assumes no padded keys).

    q_map = lambda b, qi, ki: (b, qi, q_col)
    k_map = lambda b, qi, ki: (b, ki, k_col)
    v_map = lambda b, qi, ki: (b, ki, v_col)

    return pl.pallas_call(
        functools.partial(_flash_mha_kernel, num_heads=num_heads, scale=scale),
        out_shape=jax.ShapeDtypeStruct((B, L, E), out_dtype),
        grid=(B, L // tq, S // tkv),
        in_specs=[
            pl.BlockSpec((1, tq, E), q_map),
            pl.BlockSpec((1, tkv, E), k_map),
            pl.BlockSpec((1, tkv, E), v_map),
        ],
        out_specs=pl.BlockSpec((1, tq, E), lambda b, qi, ki: (b, qi, 0)),
        scratch_shapes=[pltpu.VMEM((tq, num_heads), jnp.float32),   # running max
                        pltpu.VMEM((tq, num_heads), jnp.float32),   # running sum
                        pltpu.VMEM((tq, E), jnp.float32)],          # acc
        compiler_params=pltpu.CompilerParams(
            dimension_semantics=("parallel", "parallel", "arbitrary")),
    )(q_arr, k_arr, v_arr)


# --------------------------- model (JAX glue) ------------------------------ #
# Activations are kept flattened batch-major: x2d has shape (B*S, E) with rows
# contiguous per batch element, so (B, S, E)-style reshapes are free.

def self_attention(x2d, B, S, p, num_heads):
    E = x2d.shape[1]
    qkv = pallas_linear(x2d, p["w_in"], p["b_in"], out_dtype=MATMUL_DTYPE)  # (B*S, 3E)
    if E % 128 == 0:
        # Feed the packed projection straight to the kernel (column blocks 0/1/2).
        qkv3 = qkv.reshape(B, S, 3 * E)
        attn = pallas_flash_attention(qkv3, qkv3, qkv3, 0, 1, 2, S, S, E, num_heads)
    else:
        q = qkv[:, :E].reshape(B, S, E)
        k = qkv[:, E:2 * E].reshape(B, S, E)
        v = qkv[:, 2 * E:].reshape(B, S, E)
        attn = pallas_flash_attention(q, k, v, 0, 0, 0, S, S, E, num_heads)
    return attn.reshape(B * S, E)                    # bf16, feeds out-projection


def cross_attention(y2d, B, L, enc2d, S, p, num_heads):
    E = y2d.shape[1]
    q = pallas_linear(y2d, p["w_q"], p["b_q"], out_dtype=MATMUL_DTYPE).reshape(B, L, E)
    kv = pallas_linear(enc2d, p["w_kv"], p["b_kv"], out_dtype=MATMUL_DTYPE)  # (B*S, 2E)
    if E % 128 == 0:
        kv3 = kv.reshape(B, S, 2 * E)
        attn = pallas_flash_attention(q, kv3, kv3, 0, 0, 1, L, S, E, num_heads)
    else:
        k = kv[:, :E].reshape(B, S, E)
        v = kv[:, E:].reshape(B, S, E)
        attn = pallas_flash_attention(q, k, v, 0, 0, 0, L, S, E, num_heads)
    return attn.reshape(B * L, E)


def encoder_block(x2d, B, S, p, num_heads):
    attn = self_attention(x2d, B, S, p["self_attn"], num_heads)
    x2d = linear_residual_ln(attn, p["self_attn"]["wo"], p["self_attn"]["bo"],
                             x2d, p["ln1_g"], p["ln1_b"])
    ff1 = pallas_linear(x2d, p["ff_w1"], p["ff_b1"], activation="relu",
                        out_dtype=MATMUL_DTYPE)
    x2d = linear_residual_ln(ff1, p["ff_w2"], p["ff_b2"],
                             x2d, p["ln2_g"], p["ln2_b"])
    return x2d


def decoder_block(y2d, B, L, enc2d, S, p, num_heads):
    attn = self_attention(y2d, B, L, p["self_attn"], num_heads)
    y2d = linear_residual_ln(attn, p["self_attn"]["wo"], p["self_attn"]["bo"],
                             y2d, p["ln1_g"], p["ln1_b"])
    xattn = cross_attention(y2d, B, L, enc2d, S, p["cross_attn"], num_heads)
    y2d = linear_residual_ln(xattn, p["cross_attn"]["wo"], p["cross_attn"]["bo"],
                             y2d, p["ln2_g"], p["ln2_b"])
    ff1 = pallas_linear(y2d, p["ff_w1"], p["ff_b1"], activation="relu",
                        out_dtype=MATMUL_DTYPE)
    y2d = linear_residual_ln(ff1, p["ff_w2"], p["ff_b2"],
                             y2d, p["ln3_g"], p["ln3_b"])
    return y2d


def sinusoidal_pe(context_size, d_model):
    pos = jnp.arange(context_size, dtype=jnp.float32)[:, None]
    i = jnp.arange(0, d_model, 2, dtype=jnp.float32)[None, :]
    angle = pos / jnp.power(10000.0, i / float(d_model))
    pe = jnp.zeros((context_size, d_model), jnp.float32)
    pe = pe.at[:, 0::2].set(jnp.sin(angle))
    pe = pe.at[:, 1::2].set(jnp.cos(angle))
    return pe


def init_params(key, vocab_size, context_size, d_model, d_ff, num_heads, n_blocks):
    """Weights are pre-cast to bf16 (MXU operand dtype) and biases pre-shaped
    (1, N) f32 ONCE here, so the jitted forward never re-pads / re-casts them."""
    keys = iter(jax.random.split(key, 4096))

    def dense(shape, scale=0.1):
        return (scale * jax.random.normal(next(keys), shape, jnp.float32)
                ).astype(MATMUL_DTYPE)

    def bias(n):
        return jnp.zeros((1, n), jnp.float32)

    def ln():
        return jnp.ones((1, d_model), jnp.float32), jnp.zeros((1, d_model), jnp.float32)

    def self_attn_params():
        # Packed in-projection (E, 3E): columns [0:E]=Q, [E:2E]=K, [2E:3E]=V.
        return dict(w_in=dense((d_model, 3 * d_model)), b_in=bias(3 * d_model),
                    wo=dense((d_model, d_model)), bo=bias(d_model))

    def cross_attn_params():
        # Pre-split packed in-projection: Q columns and packed K|V columns.
        return dict(w_q=dense((d_model, d_model)), b_q=bias(d_model),
                    w_kv=dense((d_model, 2 * d_model)), b_kv=bias(2 * d_model),
                    wo=dense((d_model, d_model)), bo=bias(d_model))

    def enc_block_params():
        g1, b1 = ln()
        g2, b2 = ln()
        return dict(self_attn=self_attn_params(),
                    ln1_g=g1, ln1_b=b1,
                    ff_w1=dense((d_model, d_ff)), ff_b1=bias(d_ff),
                    ff_w2=dense((d_ff, d_model)), ff_b2=bias(d_model),
                    ln2_g=g2, ln2_b=b2)

    def dec_block_params():
        d = enc_block_params()
        d["cross_attn"] = cross_attn_params()
        g3, b3 = ln()
        d["ln3_g"], d["ln3_b"] = g3, b3
        return d

    return dict(
        pe=sinusoidal_pe(context_size, d_model),
        enc_emb=jax.random.normal(next(keys), (vocab_size, d_model), jnp.float32),
        dec_emb=jax.random.normal(next(keys), (vocab_size, d_model), jnp.float32),
        enc_blocks=[enc_block_params() for _ in range(n_blocks)],
        dec_blocks=[dec_block_params() for _ in range(n_blocks)],
        out_w=dense((d_model, vocab_size)),
        out_b=bias(vocab_size),
    )


def transformer_forward(params, enc_tokens, dec_tokens, num_heads):
    """enc_tokens, dec_tokens: (S, B) int32.  Returns (S_dec, B, vocab) f32."""
    Le, B = enc_tokens.shape
    Ld, _ = dec_tokens.shape
    d_model = params["enc_emb"].shape[1]
    vocab = params["out_w"].shape[1]

    # ---- Encoder ----  (embedding gather + PE add are plain-JAX glue)
    x = params["enc_emb"][enc_tokens.T] + params["pe"][:Le][None, :, :]   # (B, Le, D)
    x2d = x.reshape(B * Le, d_model)
    for p in params["enc_blocks"]:
        x2d = encoder_block(x2d, B, Le, p, num_heads)
    enc2d = x2d

    # ---- Decoder ---- (reference module passes no masks: plain bidirectional attn)
    y = params["dec_emb"][dec_tokens.T] + params["pe"][:Ld][None, :, :]   # (B, Ld, D)
    y2d = y.reshape(B * Ld, d_model)
    for p in params["dec_blocks"]:
        y2d = decoder_block(y2d, B, Ld, enc2d, Le, p, num_heads)

    # Re-order the SMALL (B*Ld, E) activations to sequence-major before the
    # vocab projection so the LARGE logits come out already in (Ld, B, V) layout.
    y_seq_major = y2d.reshape(B, Ld, d_model).transpose(1, 0, 2).reshape(Ld * B, d_model)
    logits = pallas_linear(y_seq_major, params["out_w"], params["out_b"],
                           out_dtype=jnp.float32)                         # (Ld*B, V)
    return logits.reshape(Ld, B, vocab)


if __name__ == "__main__":
    vocab_size = 64
    context_size = 16
    d_model, d_ff, num_heads, n_blocks = 32, 64, 4, 2
    seq_enc, seq_dec, batch = 8, 8, 2

    key = jax.random.PRNGKey(0)
    pkey, ekey, dkey = jax.random.split(key, 3)
    params = init_params(pkey, vocab_size, context_size, d_model, d_ff,
                         num_heads, n_blocks)
    input_encoder = jax.random.randint(ekey, (seq_enc, batch), 0, vocab_size,
                                       dtype=jnp.int32)
    input_decoder = jax.random.randint(dkey, (seq_dec, batch), 0, vocab_size,
                                       dtype=jnp.int32)

    fwd = jax.jit(functools.partial(transformer_forward, num_heads=num_heads))
    out = fwd(params, input_encoder, input_decoder)
    out = jax.block_until_ready(out)
    assert out.shape == (seq_dec, batch, vocab_size)
    assert bool(jnp.all(jnp.isfinite(out)))
    print("KERNEL_OK")
</pallas_src>

<mosaic_0001>
module attributes {stable_mosaic.version = 11 : i64} {
  func.func @_matmul_bias_kernel(%arg0: i32, %arg1: i32, %arg2: i32, %arg3: memref<16x32xf32, #tpu.memory_space<vmem>>, %arg4: memref<32x96xbf16, #tpu.memory_space<vmem>>, %arg5: memref<1x96xf32, #tpu.memory_space<vmem>>, %arg6: memref<16x96xbf16, #tpu.memory_space<vmem>>, %arg7: memref<16x96xf32, #tpu.memory_space<vmem>>) attributes {dimension_semantics = [#tpu.dimension_semantics<parallel>, #tpu.dimension_semantics<parallel>, #tpu.dimension_semantics<arbitrary>], iteration_bounds = array<i64: 1, 1, 1>, scalar_prefetch = 0 : i64, scratch_operands = 1 : i64, tpu.core_type = #tpu.core_type<tc>, window_params = [{transform_indices = @transform_0, window_bounds = array<i64: 16, 32>}, {transform_indices = @transform_1, window_bounds = array<i64: 32, 96>}, {transform_indices = @transform_2, window_bounds = array<i64: 1, 96>}, {transform_indices = @transform_3, window_bounds = array<i64: 16, 96>}]} {
    %c0_i32 = arith.constant 0 : i32
    %0 = arith.cmpi eq, %arg2, %c0_i32 : i32
    %1 = arith.extui %0 : i1 to i32
    %c0_i32_0 = arith.constant 0 : i32
    %2 = arith.cmpi ne, %1, %c0_i32_0 : i32
    scf.if %2 {
      %cst_10 = arith.constant 0.000000e+00 : f32
      %13 = vector.broadcast %cst_10 : f32 to vector<16x96xf32>
      %c0_11 = arith.constant 0 : index
      %c0_12 = arith.constant 0 : index
      %14 = vector.load %arg7[%c0_11, %c0_12] : memref<16x96xf32, #tpu.memory_space<vmem>>, vector<16x96xf32>
      tpu.vector_store %arg7[%c0_11, %c0_12], %13 {strides = array<i32>} : memref<16x96xf32, #tpu.memory_space<vmem>>, vector<16x96xf32>,
    } else {
    }
    %c0 = arith.constant 0 : index
    %c0_1 = arith.constant 0 : index
    %3 = vector.load %arg7[%c0, %c0_1] : memref<16x96xf32, #tpu.memory_space<vmem>>, vector<16x96xf32>
    %c0_2 = arith.constant 0 : index
    %c0_3 = arith.constant 0 : index
    %4 = vector.load %arg3[%c0_2, %c0_3] : memref<16x32xf32, #tpu.memory_space<vmem>>, vector<16x32xf32>
    %5 = arith.truncf %4 : vector<16x32xf32> to vector<16x32xbf16>
    %c0_4 = arith.constant 0 : index
    %c0_5 = arith.constant 0 : index
    %6 = vector.load %arg4[%c0_4, %c0_5] : memref<32x96xbf16, #tpu.memory_space<vmem>>, vector<32x96xbf16>
    %cst = arith.constant dense<0.000000e+00> : vector<16x96xf32>
    %7 = tpu.matmul %5, %6, %cst {dimension_numbers = #tpu.dot_dimension_numbers<[1], [0], [0], [1], [0, 0, 1, 1], [], []>} : vector<16x32xbf16>, vector<32x96xbf16>, vector<16x96xf32> -> vector<16x96xf32>
    %8 = arith.addf %3, %7 : vector<16x96xf32>
    %c0_6 = arith.constant 0 : index
    %c0_7 = arith.constant 0 : index
    %9 = vector.load %arg7[%c0_6, %c0_7] : memref<16x96xf32, #tpu.memory_space<vmem>>, vector<16x96xf32>
    tpu.vector_store %arg7[%c0_6, %c0_7], %8 {strides = array<i32>} : memref<16x96xf32, #tpu.memory_space<vmem>>, vector<16x96xf32>,
    %c0_i32_8 = arith.constant 0 : i32
    %10 = arith.cmpi eq, %arg2, %c0_i32_8 : i32
    %11 = arith.extui %10 : i1 to i32
    %c0_i32_9 = arith.constant 0 : i32
    %12 = arith.cmpi ne, %11, %c0_i32_9 : i32
    scf.if %12 {
      %c0_10 = arith.constant 0 : index
      %c0_11 = arith.constant 0 : index
      %13 = vector.load %arg7[%c0_10, %c0_11] : memref<16x96xf32, #tpu.memory_space<vmem>>, vector<16x96xf32>
      %c0_12 = arith.constant 0 : index
      %c0_13 = arith.constant 0 : index
      %14 = vector.load %arg5[%c0_12, %c0_13] : memref<1x96xf32, #tpu.memory_space<vmem>>, vector<1x96xf32>
      %15 = vector.broadcast %14 : vector<1x96xf32> to vector<16x96xf32>
      %16 = arith.addf %13, %15 : vector<16x96xf32>
      %17 = arith.truncf %16 : vector<16x96xf32> to vector<16x96xbf16>
      %c0_14 = arith.constant 0 : index
      %c0_15 = arith.constant 0 : index
      %18 = vector.load %arg6[%c0_14, %c0_15] : memref<16x96xbf16, #tpu.memory_space<vmem>>, vector<16x96xbf16>
      tpu.vector_store %arg6[%c0_14, %c0_15], %17 {strides = array<i32>} : memref<16x96xbf16, #tpu.memory_space<vmem>>, vector<16x96xbf16>,
    } else {
    }
    return
  }
  func.func @transform_0(%arg0: i32, %arg1: i32, %arg2: i32) -> (i32, i32) {
    %c0_i32 = arith.constant 0 : i32
    return %arg0, %arg2 : i32, i32
  }
  func.func @transform_1(%arg0: i32, %arg1: i32, %arg2: i32) -> (i32, i32) {
    %c0_i32 = arith.constant 0 : i32
    return %arg2, %arg1 : i32, i32
  }
  func.func @transform_2(%arg0: i32, %arg1: i32, %arg2: i32) -> (i32, i32) {
    %c0_i32 = arith.constant 0 : i32
    %c0_i32_0 = arith.constant 0 : i32
    return %c0_i32, %arg1 : i32, i32
  }
  func.func @transform_3(%arg0: i32, %arg1: i32, %arg2: i32) -> (i32, i32) {
    %c0_i32 = arith.constant 0 : i32
    return %arg0, %arg1 : i32, i32
  }
}

module attributes {stable_mosaic.version = 11 : i64} {
  func.func @_flash_mha_kernel(%arg0: i32, %arg1: i32, %arg2: i32, %arg3: memref<1x8x32xbf16, #tpu.memory_space<vmem>>, %arg4: memref<1x8x32xbf16, #tpu.memory_space<vmem>>, %arg5: memref<1x8x32xbf16, #tpu.memory_space<vmem>>, %arg6: memref<1x8x32xbf16, #tpu.memory_space<vmem>>, %arg7: memref<8x4xf32, #tpu.memory_space<vmem>>, %arg8: memref<8x4xf32, #tpu.memory_space<vmem>>, %arg9: memref<8x32xf32, #tpu.memory_space<vmem>>) attributes {dimension_semantics = [#tpu.dimension_semantics<parallel>, #tpu.dimension_semantics<parallel>, #tpu.dimension_semantics<arbitrary>], iteration_bounds = array<i64: 2, 1, 1>, scalar_prefetch = 0 : i64, scratch_operands = 3 : i64, tpu.core_type = #tpu.core_type<tc>, window_params = [{transform_indices = @transform_0, window_bounds = array<i64: 1, 8, 32>}, {transform_indices = @transform_1, window_bounds = array<i64: 1, 8, 32>}, {transform_indices = @transform_2, window_bounds = array<i64: 1, 8, 32>}, {transform_indices = @transform_3, window_bounds = array<i64: 1, 8, 32>}]} {
    %c0_i32 = arith.constant 0 : i32
    %0 = arith.cmpi eq, %arg2, %c0_i32 : i32
    %1 = arith.extui %0 : i1 to i32
    %c0_i32_0 = arith.constant 0 : i32
    %2 = arith.cmpi ne, %1, %c0_i32_0 : i32
    scf.if %2 {
      %cst_99 = arith.constant 0xFF800000 : f32
      %134 = vector.broadcast %cst_99 : f32 to vector<8x4xf32>
      %c0_100 = arith.constant 0 : index
      %c0_101 = arith.constant 0 : index
      %135 = vector.load %arg7[%c0_100, %c0_101] : memref<8x4xf32, #tpu.memory_space<vmem>>, vector<8x4xf32>
      tpu.vector_store %arg7[%c0_100, %c0_101], %134 {strides = array<i32>} : memref<8x4xf32, #tpu.memory_space<vmem>>, vector<8x4xf32>,
      %cst_102 = arith.constant 0.000000e+00 : f32
      %136 = vector.broadcast %cst_102 : f32 to vector<8x4xf32>
      %c0_103 = arith.constant 0 : index
      %c0_104 = arith.constant 0 : index
      %137 = vector.load %arg8[%c0_103, %c0_104] : memref<8x4xf32, #tpu.memory_space<vmem>>, vector<8x4xf32>
      tpu.vector_store %arg8[%c0_103, %c0_104], %136 {strides = array<i32>} : memref<8x4xf32, #tpu.memory_space<vmem>>, vector<8x4xf32>,
      %cst_105 = arith.constant 0.000000e+00 : f32
      %138 = vector.broadcast %cst_105 : f32 to vector<8x32xf32>
      %c0_106 = arith.constant 0 : index
      %c0_107 = arith.constant 0 : index
      %139 = vector.load %arg9[%c0_106, %c0_107] : memref<8x32xf32, #tpu.memory_space<vmem>>, vector<8x32xf32>
      tpu.vector_store %arg9[%c0_106, %c0_107], %138 {strides = array<i32>} : memref<8x32xf32, #tpu.memory_space<vmem>>, vector<8x32xf32>,
    } else {
    }
    %c0 = arith.constant 0 : index
    %c0_1 = arith.constant 0 : index
    %c0_2 = arith.constant 0 : index
    %3 = vector.load %arg3[%c0, %c0_1, %c0_2] : memref<1x8x32xbf16, #tpu.memory_space<vmem>>, vector<1x8x8xbf16>
    %4 = vector.shape_cast %3 : vector<1x8x8xbf16> to vector<8x8xbf16>
    %c0_3 = arith.constant 0 : index
    %c0_4 = arith.constant 0 : index
    %c0_5 = arith.constant 0 : index
    %5 = vector.load %arg4[%c0_3, %c0_4, %c0_5] : memref<1x8x32xbf16, #tpu.memory_space<vmem>>, vector<1x8x8xbf16>
    %6 = vector.shape_cast %5 : vector<1x8x8xbf16> to vector<8x8xbf16>
    %c0_6 = arith.constant 0 : index
    %c0_7 = arith.constant 0 : index
    %c0_8 = arith.constant 0 : index
    %7 = vector.load %arg5[%c0_6, %c0_7, %c0_8] : memref<1x8x32xbf16, #tpu.memory_space<vmem>>, vector<1x8x8xbf16>
    %8 = vector.shape_cast %7 : vector<1x8x8xbf16> to vector<8x8xbf16>
    %cst = arith.constant dense<0.000000e+00> : vector<8x8xf32>
    %9 = tpu.matmul %4, %6, %cst {dimension_numbers = #tpu.dot_dimension_numbers<[1], [1], [0], [0], [0, 0, 1, 0], [], []>} : vector<8x8xbf16>, vector<8x8xbf16>, vector<8x8xf32> -> vector<8x8xf32>
    %cst_9 = arith.constant 0.353553385 : f32
    %10 = vector.broadcast %cst_9 : f32 to vector<8x8xf32>
    %11 = arith.mulf %9, %10 : vector<8x8xf32>
    %c0_10 = arith.constant 0 : index
    %c0_11 = arith.constant 0 : index
    %12 = vector.load %arg7[%c0_10, %c0_11] : memref<8x4xf32, #tpu.memory_space<vmem>>, vector<8x1xf32>
    %c0_12 = arith.constant 0 : index
    %c0_13 = arith.constant 0 : index
    %13 = vector.load %arg8[%c0_12, %c0_13] : memref<8x4xf32, #tpu.memory_space<vmem>>, vector<8x1xf32>
    %cst_14 = arith.constant dense<0xFF800000> : vector<8xf32>
    %14 = vector.multi_reduction <maximumf>, %11, %cst_14 [1] : vector<8x8xf32> to vector<8xf32>
    %15 = vector.shape_cast %14 : vector<8xf32> to vector<8x1xf32>
    %16 = arith.maximumf %12, %15 : vector<8x1xf32>
    %17 = arith.subf %12, %16 : vector<8x1xf32>
    %18 = math.exp %17 : vector<8x1xf32>
    %19 = vector.broadcast %16 : vector<8x1xf32> to vector<8x8xf32>
    %20 = arith.subf %11, %19 : vector<8x8xf32>
    %21 = math.exp %20 : vector<8x8xf32>
    %22 = arith.mulf %18, %13 : vector<8x1xf32>
    %cst_15 = arith.constant dense<0.000000e+00> : vector<8xf32>
    %23 = vector.multi_reduction <add>, %21, %cst_15 [1] : vector<8x8xf32> to vector<8xf32>
    %24 = vector.shape_cast %23 : vector<8xf32> to vector<8x1xf32>
    %25 = arith.addf %22, %24 : vector<8x1xf32>
    %c0_16 = arith.constant 0 : index
    %c0_17 = arith.constant 0 : index
    %26 = vector.load %arg8[%c0_16, %c0_17] : memref<8x4xf32, #tpu.memory_space<vmem>>, vector<8x1xf32>
    tpu.vector_store %arg8[%c0_16, %c0_17], %25 {strides = array<i32>} : memref<8x4xf32, #tpu.memory_space<vmem>>, vector<8x1xf32>,
    %c0_18 = arith.constant 0 : index
    %c0_19 = arith.constant 0 : index
    %27 = vector.load %arg7[%c0_18, %c0_19] : memref<8x4xf32, #tpu.memory_space<vmem>>, vector<8x1xf32>
    tpu.vector_store %arg7[%c0_18, %c0_19], %16 {strides = array<i32>} : memref<8x4xf32, #tpu.memory_space<vmem>>, vector<8x1xf32>,
    %c0_20 = arith.constant 0 : index
    %c0_21 = arith.constant 0 : index
    %28 = vector.load %arg9[%c0_20, %c0_21] : memref<8x32xf32, #tpu.memory_space<vmem>>, vector<8x8xf32>
    %29 = vector.broadcast %18 : vector<8x1xf32> to vector<8x8xf32>
    %30 = arith.mulf %29, %28 : vector<8x8xf32>
    %31 = arith.truncf %21 : vector<8x8xf32> to vector<8x8xbf16>
    %cst_22 = arith.constant dense<0.000000e+00> : vector<8x8xf32>
    %32 = tpu.matmul %31, %8, %cst_22 {dimension_numbers = #tpu.dot_dimension_numbers<[1], [0], [0], [1], [0, 0, 1, 1], [], []>} : vector<8x8xbf16>, vector<8x8xbf16>, vector<8x8xf32> -> vector<8x8xf32>
    %33 = arith.addf %30, %32 : vector<8x8xf32>
    %c0_23 = arith.constant 0 : index
    %c0_24 = arith.constant 0 : index
    %34 = vector.load %arg9[%c0_23, %c0_24] : memref<8x32xf32, #tpu.memory_space<vmem>>, vector<8x8xf32>
    tpu.vector_store %arg9[%c0_23, %c0_24], %33 {strides = array<i32>} : memref<8x32xf32, #tpu.memory_space<vmem>>, vector<8x8xf32>,
    %c0_25 = arith.constant 0 : index
    %c0_26 = arith.constant 0 : index
    %c8 = arith.constant 8 : index
    %35 = vector.load %arg3[%c0_25, %c0_26, %c8] : memref<1x8x32xbf16, #tpu.memory_space<vmem>>, vector<1x8x8xbf16>
    %36 = vector.shape_cast %35 : vector<1x8x8xbf16> to vector<8x8xbf16>
    %c0_27 = arith.constant 0 : index
    %c0_28 = arith.constant 0 : index
    %c8_29 = arith.constant 8 : index
    %37 = vector.load %arg4[%c0_27, %c0_28, %c8_29] : memref<1x8x32xbf16, #tpu.memory_space<vmem>>, vector<1x8x8xbf16>
    %38 = vector.shape_cast %37 : vector<1x8x8xbf16> to vector<8x8xbf16>
    %c0_30 = arith.constant 0 : index
    %c0_31 = arith.constant 0 : index
    %c8_32 = arith.constant 8 : index
    %39 = vector.load %arg5[%c0_30, %c0_31, %c8_32] : memref<1x8x32xbf16, #tpu.memory_space<vmem>>, vector<1x8x8xbf16>
    %40 = vector.shape_cast %39 : vector<1x8x8xbf16> to vector<8x8xbf16>
    %cst_33 = arith.constant dense<0.000000e+00> : vector<8x8xf32>
    %41 = tpu.matmul %36, %38, %cst_33 {dimension_numbers = #tpu.dot_dimension_numbers<[1], [1], [0], [0], [0, 0, 1, 0], [], []>} : vector<8x8xbf16>, vector<8x8xbf16>, vector<8x8xf32> -> vector<8x8xf32>
    %cst_34 = arith.constant 0.353553385 : f32
    %42 = vector.broadcast %cst_34 : f32 to vector<8x8xf32>
    %43 = arith.mulf %41, %42 : vector<8x8xf32>
    %c0_35 = arith.constant 0 : index
    %c1 = arith.constant 1 : index
    %44 = vector.load %arg7[%c0_35, %c1] : memref<8x4xf32, #tpu.memory_space<vmem>>, vector<8x1xf32>
    %c0_36 = arith.constant 0 : index
    %c1_37 = arith.constant 1 : index
    %45 = vector.load %arg8[%c0_36, %c1_37] : memref<8x4xf32, #tpu.memory_space<vmem>>, vector<8x1xf32>
    %cst_38 = arith.constant dense<0xFF800000> : vector<8xf32>
    %46 = vector.multi_reduction <maximumf>, %43, %cst_38 [1] : vector<8x8xf32> to vector<8xf32>
    %47 = vector.shape_cast %46 : vector<8xf32> to vector<8x1xf32>
    %48 = arith.maximumf %44, %47 : vector<8x1xf32>
    %49 = arith.subf %44, %48 : vector<8x1xf32>
    %50 = math.exp %49 : vector<8x1xf32>
    %51 = vector.broadcast %48 : vector<8x1xf32> to vector<8x8xf32>
    %52 = arith.subf %43, %51 : vector<8x8xf32>
    %53 = math.exp %52 : vector<8x8xf32>
    %54 = arith.mulf %50, %45 : vector<8x1xf32>
    %cst_39 = arith.constant dense<0.000000e+00> : vector<8xf32>
    %55 = vector.multi_reduction <add>, %53, %cst_39 [1] : vector<8x8xf32> to vector<8xf32>
    %56 = vector.shape_cast %55 : vector<8xf32> to vector<8x1xf32>
    %57 = arith.addf %54, %56 : vector<8x1xf32>
    %c0_40 = arith.constant 0 : index
    %c1_41 = arith.constant 1 : index
    %58 = vector.load %arg8[%c0_40, %c1_41] : memref<8x4xf32, #tpu.memory_space<vmem>>, vector<8x1xf32>
    tpu.vector_store %arg8[%c0_40, %c1_41], %57 {strides = array<i32>} : memref<8x4xf32, #tpu.memory_space<vmem>>, vector<8x1xf32>,
    %c0_42 = arith.constant 0 : index
    %c1_43 = arith.constant 1 : index
    %59 = vector.load %arg7[%c0_42, %c1_43] : memref<8x4xf32, #tpu.memory_space<vmem>>, vector<8x1xf32>
    tpu.vector_store %arg7[%c0_42, %c1_43], %48 {strides = array<i32>} : memref<8x4xf32, #tpu.memory_space<vmem>>, vector<8x1xf32>,
    %c0_44 = arith.constant 0 : index
    %c8_45 = arith.constant 8 : index
    %60 = vector.load %arg9[%c0_44, %c8_45] : memref<8x32xf32, #tpu.memory_space<vmem>>, vector<8x8xf32>
    %61 = vector.broadcast %50 : vector<8x1xf32> to vector<8x8xf32>
    %62 = arith.mulf %61, %60 : vector<8x8xf32>
    %63 = arith.truncf %53 : vector<8x8xf32> to vector<8x8xbf16>
    %cst_46 = arith.constant dense<0.000000e+00> : vector<8x8xf32>
    %64 = tpu.matmul %63, %40, %cst_46 {dimension_numbers = #tpu.dot_dimension_numbers<[1], [0], [0], [1], [0, 0, 1, 1], [], []>} : vector<8x8xbf16>, vector<8x8xbf16>, vector<8x8xf32> -> vector<8x8xf32>
    %65 = arith.addf %62, %64 : vector<8x8xf32>
    %c0_47 = arith.constant 0 : index
    %c8_48 = arith.constant 8 : index
    %66 = vector.load %arg9[%c0_47, %c8_48] : memref<8x32xf32, #tpu.memory_space<vmem>>, vector<8x8xf32>
    tpu.vector_store %arg9[%c0_47, %c8_48], %65 {strides = array<i32>} : memref<8x32xf32, #tpu.memory_space<vmem>>, vector<8x8xf32>,
    %c0_49 = arith.constant 0 : index
    %c0_50 = arith.constant 0 : index
    %c16 = arith.constant 16 : index
    %67 = vector.load %arg3[%c0_49, %c0_50, %c16] : memref<1x8x32xbf16, #tpu.memory_space<vmem>>, vector<1x8x8xbf16>
    %68 = vector.shape_cast %67 : vector<1x8x8xbf16> to vector<8x8xbf16>
    %c0_51 = arith.constant 0 : index
    %c0_52 = arith.constant 0 : index
    %c16_53 = arith.constant 16 : index
    %69 = vector.load %arg4[%c0_51, %c0_52, %c16_53] : memref<1x8x32xbf16, #tpu.memory_space<vmem>>, vector<1x8x8xbf16>
    %70 = vector.shape_cast %69 : vector<1x8x8xbf16> to vector<8x8xbf16>
    %c0_54 = arith.constant 0 : index
    %c0_55 = arith.constant 0 : index
    %c16_56 = arith.constant 16 : index
    %71 = vector.load %arg5[%c0_54, %c0_55, %c16_56] : memref<1x8x32xbf16, #tpu.memory_space<vmem>>, vector<1x8x8xbf16>
    %72 = vector.shape_cast %71 : vector<1x8x8xbf16> to vector<8x8xbf16>
    %cst_57 = arith.constant dense<0.000000e+00> : vector<8x8xf32>
    %73 = tpu.matmul %68, %70, %cst_57 {dimension_numbers = #tpu.dot_dimension_numbers<[1], [1], [0], [0], [0, 0, 1, 0], [], []>} : vector<8x8xbf16>, vector<8x8xbf16>, vector<8x8xf32> -> vector<8x8xf32>
    %cst_58 = arith.constant 0.353553385 : f32
    %74 = vector.broadcast %cst_58 : f32 to vector<8x8xf32>
    %75 = arith.mulf %73, %74 : vector<8x8xf32>
    %c0_59 = arith.constant 0 : index
    %c2 = arith.constant 2 : index
    %76 = vector.load %arg7[%c0_59, %c2] : memref<8x4xf32, #tpu.memory_space<vmem>>, vector<8x1xf32>
    %c0_60 = arith.constant 0 : index
    %c2_61 = arith.constant 2 : index
    %77 = vector.load %arg8[%c0_60, %c2_61] : memref<8x4xf32, #tpu.memory_space<vmem>>, vector<8x1xf32>
    %cst_62 = arith.constant dense<0xFF800000> : vector<8xf32>
    %78 = vector.multi_reduction <maximumf>, %75, %cst_62 [1] : vector<8x8xf32> to vector<8xf32>
    %79 = vector.shape_cast %78 : vector<8xf32> to vector<8x1xf32>
    %80 = arith.maximumf %76, %79 : vector<8x1xf32>
    %81 = arith.subf %76, %80 : vector<8x1xf32>
    %82 = math.exp %81 : vector<8x1xf32>
    %83 = vector.broadcast %80 : vector<8x1xf32> to vector<8x8xf32>
    %84 = arith.subf %75, %83 : vector<8x8xf32>
    %85 = math.exp %84 : vector<8x8xf32>
    %86 = arith.mulf %82, %77 : vector<8x1xf32>
    %cst_63 = arith.constant dense<0.000000e+00> : vector<8xf32>
    %87 = vector.multi_reduction <add>, %85, %cst_63 [1] : vector<8x8xf32> to vector<8xf32>
    %88 = vector.shape_cast %87 : vector<8xf32> to vector<8x1xf32>
    %89 = arith.addf %86, %88 : vector<8x1xf32>
    %c0_64 = arith.constant 0 : index
    %c2_65 = arith.constant 2 : index
    %90 = vector.load %arg8[%c0_64, %c2_65] : memref<8x4xf32, #tpu.memory_space<vmem>>, vector<8x1xf32>
    tpu.vector_store %arg8[%c0_64, %c2_65], %89 {strides = array<i32>} : memref<8x4xf32, #tpu.memory_space<vmem>>, vector<8x1xf32>,
    %c0_66 = arith.constant 0 : index
    %c2_67 = arith.constant 2 : index
    %91 = vector.load %arg7[%c0_66, %c2_67] : memref<8x4xf32, #tpu.memory_space<vmem>>, vector<8x1xf32>
    tpu.vector_store %arg7[%c0_66, %c2_67], %80 {strides = array<i32>} : memref<8x4xf32, #tpu.memory_space<vmem>>, vector<8x1xf32>,
    %c0_68 = arith.constant 0 : index
    %c16_69 = arith.constant 16 : index
    %92 = vector.load %arg9[%c0_68, %c16_69] : memref<8x32xf32, #tpu.memory_space<vmem>>, vector<8x8xf32>
    %93 = vector.broadcast %82 : vector<8x1xf32> to vector<8x8xf32>
    %94 = arith.mulf %93, %92 : vector<8x8xf32>
    %95 = arith.truncf %85 : vector<8x8xf32> to vector<8x8xbf16>
    %cst_70 = arith.constant dense<0.000000e+00> : vector<8x8xf32>
    %96 = tpu.matmul %95, %72, %cst_70 {dimension_numbers = #tpu.dot_dimension_numbers<[1], [0], [0], [1], [0, 0, 1, 1], [], []>} : vector<8x8xbf16>, vector<8x8xbf16>, vector<8x8xf32> -> vector<8x8xf32>
    %97 = arith.addf %94, %96 : vector<8x8xf32>
    %c0_71 = arith.constant 0 : index
    %c16_72 = arith.constant 16 : index
    %98 = vector.load %arg9[%c0_71, %c16_72] : memref<8x32xf32, #tpu.memory_space<vmem>>, vector<8x8xf32>
    tpu.vector_store %arg9[%c0_71, %c16_72], %97 {strides = array<i32>} : memref<8x32xf32, #tpu.memory_space<vmem>>, vector<8x8xf32>,
    %c0_73 = arith.constant 0 : index
    %c0_74 = arith.constant 0 : index
    %c24 = arith.constant 24 : index
    %99 = vector.load %arg3[%c0_73, %c0_74, %c24] : memref<1x8x32xbf16, #tpu.memory_space<vmem>>, vector<1x8x8xbf16>
    %100 = vector.shape_cast %99 : vector<1x8x8xbf16> to vector<8x8xbf16>
    %c0_75 = arith.constant 0 : index
    %c0_76 = arith.constant 0 : index
    %c24_77 = arith.constant 24 : index
    %101 = vector.load %arg4[%c0_75, %c0_76, %c24_77] : memref<1x8x32xbf16, #tpu.memory_space<vmem>>, vector<1x8x8xbf16>
    %102 = vector.shape_cast %101 : vector<1x8x8xbf16> to vector<8x8xbf16>
    %c0_78 = arith.constant 0 : index
    %c0_79 = arith.constant 0 : index
    %c24_80 = arith.constant 24 : index
    %103 = vector.load %arg5[%c0_78, %c0_79, %c24_80] : memref<1x8x32xbf16, #tpu.memory_space<vmem>>, vector<1x8x8xbf16>
    %104 = vector.shape_cast %103 : vector<1x8x8xbf16> to vector<8x8xbf16>
    %cst_81 = arith.constant dense<0.000000e+00> : vector<8x8xf32>
    %105 = tpu.matmul %100, %102, %cst_81 {dimension_numbers = #tpu.dot_dimension_numbers<[1], [1], [0], [0], [0, 0, 1, 0], [], []>} : vector<8x8xbf16>, vector<8x8xbf16>, vector<8x8xf32> -> vector<8x8xf32>
    %cst_82 = arith.constant 0.353553385 : f32
    %106 = vector.broadcast %cst_82 : f32 to vector<8x8xf32>
    %107 = arith.mulf %105, %106 : vector<8x8xf32>
    %c0_83 = arith.constant 0 : index
    %c3 = arith.constant 3 : index
    %108 = vector.load %arg7[%c0_83, %c3] : memref<8x4xf32, #tpu.memory_space<vmem>>, vector<8x1xf32>
    %c0_84 = arith.constant 0 : index
    %c3_85 = arith.constant 3 : index
    %109 = vector.load %arg8[%c0_84, %c3_85] : memref<8x4xf32, #tpu.memory_space<vmem>>, vector<8x1xf32>
    %cst_86 = arith.constant dense<0xFF800000> : vector<8xf32>
    %110 = vector.multi_reduction <maximumf>, %107, %cst_86 [1] : vector<8x8xf32> to vector<8xf32>
    %111 = vector.shape_cast %110 : vector<8xf32> to vector<8x1xf32>
    %112 = arith.maximumf %108, %111 : vector<8x1xf32>
    %113 = arith.subf %108, %112 : vector<8x1xf32>
    %114 = math.exp %113 : vector<8x1xf32>
    %115 = vector.broadcast %112 : vector<8x1xf32> to vector<8x8xf32>
    %116 = arith.subf %107, %115 : vector<8x8xf32>
    %117 = math.exp %116 : vector<8x8xf32>
    %118 = arith.mulf %114, %109 : vector<8x1xf32>
    %cst_87 = arith.constant dense<0.000000e+00> : vector<8xf32>
    %119 = vector.multi_reduction <add>, %117, %cst_87 [1] : vector<8x8xf32> to vector<8xf32>
    %120 = vector.shape_cast %119 : vector<8xf32> to vector<8x1xf32>
    %121 = arith.addf %118, %120 : vector<8x1xf32>
    %c0_88 = arith.constant 0 : index
    %c3_89 = arith.constant 3 : index
    %122 = vector.load %arg8[%c0_88, %c3_89] : memref<8x4xf32, #tpu.memory_space<vmem>>, vector<8x1xf32>
    tpu.vector_store %arg8[%c0_88, %c3_89], %121 {strides = array<i32>} : memref<8x4xf32, #tpu.memory_space<vmem>>, vector<8x1xf32>,
    %c0_90 = arith.constant 0 : index
    %c3_91 = arith.constant 3 : index
    %123 = vector.load %arg7[%c0_90, %c3_91] : memref<8x4xf32, #tpu.memory_space<vmem>>, vector<8x1xf32>
    tpu.vector_store %arg7[%c0_90, %c3_91], %112 {strides = array<i32>} : memref<8x4xf32, #tpu.memory_space<vmem>>, vector<8x1xf32>,
    %c0_92 = arith.constant 0 : index
    %c24_93 = arith.constant 24 : index
    %124 = vector.load %arg9[%c0_92, %c24_93] : memref<8x32xf32, #tpu.memory_space<vmem>>, vector<8x8xf32>
    %125 = vector.broadcast %114 : vector<8x1xf32> to vector<8x8xf32>
    %126 = arith.mulf %125, %124 : vector<8x8xf32>
    %127 = arith.truncf %117 : vector<8x8xf32> to vector<8x8xbf16>
    %cst_94 = arith.constant dense<0.000000e+00> : vector<8x8xf32>
    %128 = tpu.matmul %127, %104, %cst_94 {dimension_numbers = #tpu.dot_dimension_numbers<[1], [0], [0], [1], [0, 0, 1, 1], [], []>} : vector<8x8xbf16>, vector<8x8xbf16>, vector<8x8xf32> -> vector<8x8xf32>
    %129 = arith.addf %126, %128 : vector<8x8xf32>
    %c0_95 = arith.constant 0 : index
    %c24_96 = arith.constant 24 : index
    %130 = vector.load %arg9[%c0_95, %c24_96] : memref<8x32xf32, #tpu.memory_space<vmem>>, vector<8x8xf32>
    tpu.vector_store %arg9[%c0_95, %c24_96], %129 {strides = array<i32>} : memref<8x32xf32, #tpu.memory_space<vmem>>, vector<8x8xf32>,
    %c0_i32_97 = arith.constant 0 : i32
    %131 = arith.cmpi eq, %arg2, %c0_i32_97 : i32
    %132 = arith.extui %131 : i1 to i32
    %c0_i32_98 = arith.constant 0 : i32
    %133 = arith.cmpi ne, %132, %c0_i32_98 : i32
    scf.if %133 {
      %c0_99 = arith.constant 0 : index
      %c0_100 = arith.constant 0 : index
      %134 = vector.load %arg8[%c0_99, %c0_100] : memref<8x4xf32, #tpu.memory_space<vmem>>, vector<8x4xf32>
      %135 = tpu.reciprocal %134 {approx = true} : vector<8x4xf32> -> vector<8x4xf32>
      %c0_101 = arith.constant 0 : index
      %c0_102 = arith.constant 0 : index
      %136 = vector.load %arg9[%c0_101, %c0_102] : memref<8x32xf32, #tpu.memory_space<vmem>>, vector<8x8xf32>
      %137 = vector.extract_strided_slice %135 {offsets = [0, 0], sizes = [8, 1], strides = [1, 1]} : vector<8x4xf32> to vector<8x1xf32>
      %138 = vector.broadcast %137 : vector<8x1xf32> to vector<8x8xf32>
      %139 = arith.mulf %136, %138 : vector<8x8xf32>
      %140 = arith.truncf %139 : vector<8x8xf32> to vector<8x8xbf16>
      %c0_103 = arith.constant 0 : index
      %c0_104 = arith.constant 0 : index
      %c0_105 = arith.constant 0 : index
      %141 = vector.load %arg6[%c0_103, %c0_104, %c0_105] : memref<1x8x32xbf16, #tpu.memory_space<vmem>>, vector<1x8x8xbf16>
      %142 = vector.shape_cast %141 : vector<1x8x8xbf16> to vector<8x8xbf16>
      %143 = vector.shape_cast %140 : vector<8x8xbf16> to vector<1x8x8xbf16>
      tpu.vector_store %arg6[%c0_103, %c0_104, %c0_105], %143 {strides = array<i32>} : memref<1x8x32xbf16, #tpu.memory_space<vmem>>, vector<1x8x8xbf16>,
      %c0_106 = arith.constant 0 : index
      %c8_107 = arith.constant 8 : index
      %144 = vector.load %arg9[%c0_106, %c8_107] : memref<8x32xf32, #tpu.memory_space<vmem>>, vector<8x8xf32>
      %145 = vector.extract_strided_slice %135 {offsets = [0, 1], sizes = [8, 1], strides = [1, 1]} : vector<8x4xf32> to vector<8x1xf32>
      %146 = vector.broadcast %145 : vector<8x1xf32> to vector<8x8xf32>
      %147 = arith.mulf %144, %146 : vector<8x8xf32>
      %148 = arith.truncf %147 : vector<8x8xf32> to vector<8x8xbf16>
      %c0_108 = arith.constant 0 : index
      %c0_109 = arith.constant 0 : index
      %c8_110 = arith.constant 8 : index
      %149 = vector.load %arg6[%c0_108, %c0_109, %c8_110] : memref<1x8x32xbf16, #tpu.memory_space<vmem>>, vector<1x8x8xbf16>
      %150 = vector.shape_cast %149 : vector<1x8x8xbf16> to vector<8x8xbf16>
      %151 = vector.shape_cast %148 : vector<8x8xbf16> to vector<1x8x8xbf16>
      tpu.vector_store %arg6[%c0_108, %c0_109, %c8_110], %151 {strides = array<i32>} : memref<1x8x32xbf16, #tpu.memory_space<vmem>>, vector<1x8x8xbf16>,
      %c0_111 = arith.constant 0 : index
      %c16_112 = arith.constant 16 : index
      %152 = vector.load %arg9[%c0_111, %c16_112] : memref<8x32xf32, #tpu.memory_space<vmem>>, vector<8x8xf32>
      %153 = vector.extract_strided_slice %135 {offsets = [0, 2], sizes = [8, 1], strides = [1, 1]} : vector<8x4xf32> to vector<8x1xf32>
      %154 = vector.broadcast %153 : vector<8x1xf32> to vector<8x8xf32>
      %155 = arith.mulf %152, %154 : vector<8x8xf32>
      %156 = arith.truncf %155 : vector<8x8xf32> to vector<8x8xbf16>
      %c0_113 = arith.constant 0 : index
      %c0_114 = arith.constant 0 : index
      %c16_115 = arith.constant 16 : index
      %157 = vector.load %arg6[%c0_113, %c0_114, %c16_115] : memref<1x8x32xbf16, #tpu.memory_space<vmem>>, vector<1x8x8xbf16>
      %158 = vector.shape_cast %157 : vector<1x8x8xbf16> to vector<8x8xbf16>
      %159 = vector.shape_cast %156 : vector<8x8xbf16> to vector<1x8x8xbf16>
      tpu.vector_store %arg6[%c0_113, %c0_114, %c16_115], %159 {strides = array<i32>} : memref<1x8x32xbf16, #tpu.memory_space<vmem>>, vector<1x8x8xbf16>,
      %c0_116 = arith.constant 0 : index
      %c24_117 = arith.constant 24 : index
      %160 = vector.load %arg9[%c0_116, %c24_117] : memref<8x32xf32, #tpu.memory_space<vmem>>, vector<8x8xf32>
      %161 = vector.extract_strided_slice %135 {offsets = [0, 3], sizes = [8, 1], strides = [1, 1]} : vector<8x4xf32> to vector<8x1xf32>
      %162 = vector.broadcast %161 : vector<8x1xf32> to vector<8x8xf32>
      %163 = arith.mulf %160, %162 : vector<8x8xf32>
      %164 = arith.truncf %163 : vector<8x8xf32> to vector<8x8xbf16>
      %c0_118 = arith.constant 0 : index
      %c0_119 = arith.constant 0 : index
      %c24_120 = arith.constant 24 : index
      %165 = vector.load %arg6[%c0_118, %c0_119, %c24_120] : memref<1x8x32xbf16, #tpu.memory_space<vmem>>, vector<1x8x8xbf16>
      %166 = vector.shape_cast %165 : vector<1x8x8xbf16> to vector<8x8xbf16>
      %167 = vector.shape_cast %164 : vector<8x8xbf16> to vector<1x8x8xbf16>
      tpu.vector_store %arg6[%c0_118, %c0_119, %c24_120], %167 {strides = array<i32>} : memref<1x8x32xbf16, #tpu.memory_space<vmem>>, vector<1x8x8xbf16>,
    } else {
    }
    return
  }
  func.func @transform_0(%arg0: i32, %arg1: i32, %arg2: i32) -> (i32, i32, i32) {
    %c0_i32 = arith.constant 0 : i32
    %c0_i32_0 = arith.constant 0 : i32
    return %arg0, %arg1, %c0_i32 : i32, i32, i32
  }
  func.func @transform_1(%arg0: i32, %arg1: i32, %arg2: i32) -> (i32, i32, i32) {
    %c0_i32 = arith.constant 0 : i32
    %c0_i32_0 = arith.constant 0 : i32
    return %arg0, %arg2, %c0_i32 : i32, i32, i32
  }
  func.func @transform_2(%arg0: i32, %arg1: i32, %arg2: i32) -> (i32, i32, i32) {
    %c0_i32 = arith.constant 0 : i32
    %c0_i32_0 = arith.constant 0 : i32
    return %arg0, %arg2, %c0_i32 : i32, i32, i32
  }
  func.func @transform_3(%arg0: i32, %arg1: i32, %arg2: i32) -> (i32, i32, i32) {
    %c0_i32 = arith.constant 0 : i32
    %c0_i32_0 = arith.constant 0 : i32
    return %arg0, %arg1, %c0_i32 : i32, i32, i32
  }
}

module attributes {stable_mosaic.version = 11 : i64} {
  func.func @_matmul_add_ln_kernel(%arg0: i32, %arg1: i32, %arg2: memref<16x32xbf16, #tpu.memory_space<vmem>>, %arg3: memref<32x32xbf16, #tpu.memory_space<vmem>>, %arg4: memref<1x32xf32, #tpu.memory_space<vmem>>, %arg5: memref<16x32xf32, #tpu.memory_space<vmem>>, %arg6: memref<1x32xf32, #tpu.memory_space<vmem>>, %arg7: memref<1x32xf32, #tpu.memory_space<vmem>>, %arg8: memref<16x32xf32, #tpu.memory_space<vmem>>, %arg9: memref<16x32xf32, #tpu.memory_space<vmem>>) attributes {dimension_semantics = [#tpu.dimension_semantics<parallel>, #tpu.dimension_semantics<arbitrary>], iteration_bounds = array<i64: 1, 1>, scalar_prefetch = 0 : i64, scratch_operands = 1 : i64, tpu.core_type = #tpu.core_type<tc>, window_params = [{transform_indices = @transform_0, window_bounds = array<i64: 16, 32>}, {transform_indices = @transform_1, window_bounds = array<i64: 32, 32>}, {pipeline_mode = #tpu.pipeline_mode<synchronous>, transform_indices = @transform_2, window_bounds = array<i64: 1, 32>}, {transform_indices = @transform_3, window_bounds = array<i64: 16, 32>}, {pipeline_mode = #tpu.pipeline_mode<synchronous>, transform_indices = @transform_4, window_bounds = array<i64: 1, 32>}, {pipeline_mode = #tpu.pipeline_mode<synchronous>, transform_indices = @transform_5, window_bounds = array<i64: 1, 32>}, {transform_indices = @transform_6, window_bounds = array<i64: 16, 32>}]} {
    %c0_i32 = arith.constant 0 : i32
    %0 = arith.cmpi eq, %arg1, %c0_i32 : i32
    %1 = arith.extui %0 : i1 to i32
    %c0_i32_0 = arith.constant 0 : i32
    %2 = arith.cmpi ne, %1, %c0_i32_0 : i32
    scf.if %2 {
      %cst_10 = arith.constant 0.000000e+00 : f32
      %12 = vector.broadcast %cst_10 : f32 to vector<16x32xf32>
      %c0_11 = arith.constant 0 : index
      %c0_12 = arith.constant 0 : index
      %13 = vector.load %arg9[%c0_11, %c0_12] : memref<16x32xf32, #tpu.memory_space<vmem>>, vector<16x32xf32>
      tpu.vector_store %arg9[%c0_11, %c0_12], %12 {strides = array<i32>} : memref<16x32xf32, #tpu.memory_space<vmem>>, vector<16x32xf32>,
    } else {
    }
    %c0 = arith.constant 0 : index
    %c0_1 = arith.constant 0 : index
    %3 = vector.load %arg9[%c0, %c0_1] : memref<16x32xf32, #tpu.memory_space<vmem>>, vector<16x32xf32>
    %c0_2 = arith.constant 0 : index
    %c0_3 = arith.constant 0 : index
    %4 = vector.load %arg2[%c0_2, %c0_3] : memref<16x32xbf16, #tpu.memory_space<vmem>>, vector<16x32xbf16>
    %c0_4 = arith.constant 0 : index
    %c0_5 = arith.constant 0 : index
    %5 = vector.load %arg3[%c0_4, %c0_5] : memref<32x32xbf16, #tpu.memory_space<vmem>>, vector<32x32xbf16>
    %cst = arith.constant dense<0.000000e+00> : vector<16x32xf32>
    %6 = tpu.matmul %4, %5, %cst {dimension_numbers = #tpu.dot_dimension_numbers<[1], [0], [0], [1], [0, 0, 1, 1], [], []>} : vector<16x32xbf16>, vector<32x32xbf16>, vector<16x32xf32> -> vector<16x32xf32>
    %7 = arith.addf %3, %6 : vector<16x32xf32>
    %c0_6 = arith.constant 0 : index
    %c0_7 = arith.constant 0 : index
    %8 = vector.load %arg9[%c0_6, %c0_7] : memref<16x32xf32, #tpu.memory_space<vmem>>, vector<16x32xf32>
    tpu.vector_store %arg9[%c0_6, %c0_7], %7 {strides = array<i32>} : memref<16x32xf32, #tpu.memory_space<vmem>>, vector<16x32xf32>,
    %c0_i32_8 = arith.constant 0 : i32
    %9 = arith.cmpi eq, %arg1, %c0_i32_8 : i32
    %10 = arith.extui %9 : i1 to i32
    %c0_i32_9 = arith.constant 0 : i32
    %11 = arith.cmpi ne, %10, %c0_i32_9 : i32
    scf.if %11 {
      %c0_10 = arith.constant 0 : index
      %c0_11 = arith.constant 0 : index
      %12 = vector.load %arg9[%c0_10, %c0_11] : memref<16x32xf32, #tpu.memory_space<vmem>>, vector<16x32xf32>
      %c0_12 = arith.constant 0 : index
      %c0_13 = arith.constant 0 : index
      %13 = vector.load %arg4[%c0_12, %c0_13] : memref<1x32xf32, #tpu.memory_space<vmem>>, vector<1x32xf32>
      %14 = vector.broadcast %13 : vector<1x32xf32> to vector<16x32xf32>
      %15 = arith.addf %12, %14 : vector<16x32xf32>
      %c0_14 = arith.constant 0 : index
      %c0_15 = arith.constant 0 : index
      %16 = vector.load %arg5[%c0_14, %c0_15] : memref<16x32xf32, #tpu.memory_space<vmem>>, vector<16x32xf32>
      %17 = arith.addf %15, %16 : vector<16x32xf32>
      %cst_16 = arith.constant dense<0.000000e+00> : vector<16xf32>
      %18 = vector.multi_reduction <add>, %17, %cst_16 [1] : vector<16x32xf32> to vector<16xf32>
      %19 = vector.shape_cast %18 : vector<16xf32> to vector<16x1xf32>
      %cst_17 = arith.constant 3.200000e+01 : f32
      %20 = vector.broadcast %cst_17 : f32 to vector<16x1xf32>
      %21 = arith.divf %19, %20 : vector<16x1xf32>
      %22 = vector.broadcast %21 : vector<16x1xf32> to vector<16x32xf32>
      %23 = arith.subf %17, %22 : vector<16x32xf32>
      %24 = arith.mulf %23, %23 : vector<16x32xf32>
      %cst_18 = arith.constant dense<0.000000e+00> : vector<16xf32>
      %25 = vector.multi_reduction <add>, %24, %cst_18 [1] : vector<16x32xf32> to vector<16xf32>
      %26 = vector.shape_cast %25 : vector<16xf32> to vector<16x1xf32>
      %cst_19 = arith.constant 3.200000e+01 : f32
      %27 = vector.broadcast %cst_19 : f32 to vector<16x1xf32>
      %28 = arith.divf %26, %27 : vector<16x1xf32>
      %29 = vector.broadcast %21 : vector<16x1xf32> to vector<16x32xf32>
      %30 = arith.subf %17, %29 : vector<16x32xf32>
      %cst_20 = arith.constant 9.99999974E-6 : f32
      %31 = vector.broadcast %cst_20 : f32 to vector<16x1xf32>
      %32 = arith.addf %28, %31 : vector<16x1xf32>
      %33 = math.rsqrt %32 : vector<16x1xf32>
      %34 = vector.broadcast %33 : vector<16x1xf32> to vector<16x32xf32>
      %35 = arith.mulf %30, %34 : vector<16x32xf32>
      %c0_21 = arith.constant 0 : index
      %c0_22 = arith.constant 0 : index
      %36 = vector.load %arg6[%c0_21, %c0_22] : memref<1x32xf32, #tpu.memory_space<vmem>>, vector<1x32xf32>
      %37 = vector.broadcast %36 : vector<1x32xf32> to vector<16x32xf32>
      %38 = arith.mulf %35, %37 : vector<16x32xf32>
      %c0_23 = arith.constant 0 : index
      %c0_24 = arith.constant 0 : index
      %39 = vector.load %arg7[%c0_23, %c0_24] : memref<1x32xf32, #tpu.memory_space<vmem>>, vector<1x32xf32>
      %40 = vector.broadcast %39 : vector<1x32xf32> to vector<16x32xf32>
      %41 = arith.addf %38, %40 : vector<16x32xf32>
      %c0_25 = arith.constant 0 : index
      %c0_26 = arith.constant 0 : index
      %42 = vector.load %arg8[%c0_25, %c0_26] : memref<16x32xf32, #tpu.memory_space<vmem>>, vector<16x32xf32>
      tpu.vector_store %arg8[%c0_25, %c0_26], %41 {strides = array<i32>} : memref<16x32xf32, #tpu.memory_space<vmem>>, vector<16x32xf32>,
    } else {
    }
    return
  }
  func.func @transform_0(%arg0: i32, %arg1: i32) -> (i32, i32) {
    %c0_i32 = arith.constant 0 : i32
    return %arg0, %arg1 : i32, i32
  }
  func.func @transform_1(%arg0: i32, %arg1: i32) -> (i32, i32) {
    %c0_i32 = arith.constant 0 : i32
    %c0_i32_0 = arith.constant 0 : i32
    return %arg1, %c0_i32 : i32, i32
  }
  func.func @transform_2(%arg0: i32, %arg1: i32) -> (i32, i32) {
    %c0_i32 = arith.constant 0 : i32
    %c0_i32_0 = arith.constant 0 : i32
    %c0_i32_1 = arith.constant 0 : i32
    return %c0_i32, %c0_i32_0 : i32, i32
  }
  func.func @transform_3(%arg0: i32, %arg1: i32) -> (i32, i32) {
    %c0_i32 = arith.constant 0 : i32
    %c0_i32_0 = arith.constant 0 : i32
    return %arg0, %c0_i32 : i32, i32
  }
  func.func @transform_4(%arg0: i32, %arg1: i32) -> (i32, i32) {
    %c0_i32 = arith.constant 0 : i32
    %c0_i32_0 = arith.constant 0 : i32
    %c0_i32_1 = arith.constant 0 : i32
    return %c0_i32, %c0_i32_0 : i32, i32
  }
  func.func @transform_5(%arg0: i32, %arg1: i32) -> (i32, i32) {
    %c0_i32 = arith.constant 0 : i32
    %c0_i32_0 = arith.constant 0 : i32
    %c0_i32_1 = arith.constant 0 : i32
    return %c0_i32, %c0_i32_0 : i32, i32
  }
  func.func @transform_6(%arg0: i32, %arg1: i32) -> (i32, i32) {
    %c0_i32 = arith.constant 0 : i32
    %c0_i32_0 = arith.constant 0 : i32
    return %arg0, %c0_i32 : i32, i32
  }
}

module attributes {stable_mosaic.version = 11 : i64} {
  func.func @_matmul_bias_kernel(%arg0: i32, %arg1: i32, %arg2: i32, %arg3: memref<16x32xf32, #tpu.memory_space<vmem>>, %arg4: memref<32x64xbf16, #tpu.memory_space<vmem>>, %arg5: memref<1x64xf32, #tpu.memory_space<vmem>>, %arg6: memref<16x64xbf16, #tpu.memory_space<vmem>>, %arg7: memref<16x64xf32, #tpu.memory_space<vmem>>) attributes {dimension_semantics = [#tpu.dimension_semantics<parallel>, #tpu.dimension_semantics<parallel>, #tpu.dimension_semantics<arbitrary>], iteration_bounds = array<i64: 1, 1, 1>, scalar_prefetch = 0 : i64, scratch_operands = 1 : i64, tpu.core_type = #tpu.core_type<tc>, window_params = [{transform_indices = @transform_0, window_bounds = array<i64: 16, 32>}, {transform_indices = @transform_1, window_bounds = array<i64: 32, 64>}, {transform_indices = @transform_2, window_bounds = array<i64: 1, 64>}, {transform_indices = @transform_3, window_bounds = array<i64: 16, 64>}]} {
    %c0_i32 = arith.constant 0 : i32
    %0 = arith.cmpi eq, %arg2, %c0_i32 : i32
    %1 = arith.extui %0 : i1 to i32
    %c0_i32_0 = arith.constant 0 : i32
    %2 = arith.cmpi ne, %1, %c0_i32_0 : i32
    scf.if %2 {
      %cst_10 = arith.constant 0.000000e+00 : f32
      %13 = vector.broadcast %cst_10 : f32 to vector<16x64xf32>
      %c0_11 = arith.constant 0 : index
      %c0_12 = arith.constant 0 : index
      %14 = vector.load %arg7[%c0_11, %c0_12] : memref<16x64xf32, #tpu.memory_space<vmem>>, vector<16x64xf32>
      tpu.vector_store %arg7[%c0_11, %c0_12], %13 {strides = array<i32>} : memref<16x64xf32, #tpu.memory_space<vmem>>, vector<16x64xf32>,
    } else {
    }
    %c0 = arith.constant 0 : index
    %c0_1 = arith.constant 0 : index
    %3 = vector.load %arg7[%c0, %c0_1] : memref<16x64xf32, #tpu.memory_space<vmem>>, vector<16x64xf32>
    %c0_2 = arith.constant 0 : index
    %c0_3 = arith.constant 0 : index
    %4 = vector.load %arg3[%c0_2, %c0_3] : memref<16x32xf32, #tpu.memory_space<vmem>>, vector<16x32xf32>
    %5 = arith.truncf %4 : vector<16x32xf32> to vector<16x32xbf16>
    %c0_4 = arith.constant 0 : index
    %c0_5 = arith.constant 0 : index
    %6 = vector.load %arg4[%c0_4, %c0_5] : memref<32x64xbf16, #tpu.memory_space<vmem>>, vector<32x64xbf16>
    %cst = arith.constant dense<0.000000e+00> : vector<16x64xf32>
    %7 = tpu.matmul %5, %6, %cst {dimension_numbers = #tpu.dot_dimension_numbers<[1], [0], [0], [1], [0, 0, 1, 1], [], []>} : vector<16x32xbf16>, vector<32x64xbf16>, vector<16x64xf32> -> vector<16x64xf32>
    %8 = arith.addf %3, %7 : vector<16x64xf32>
    %c0_6 = arith.constant 0 : index
    %c0_7 = arith.constant 0 : index
    %9 = vector.load %arg7[%c0_6, %c0_7] : memref<16x64xf32, #tpu.memory_space<vmem>>, vector<16x64xf32>
    tpu.vector_store %arg7[%c0_6, %c0_7], %8 {strides = array<i32>} : memref<16x64xf32, #tpu.memory_space<vmem>>, vector<16x64xf32>,
    %c0_i32_8 = arith.constant 0 : i32
    %10 = arith.cmpi eq, %arg2, %c0_i32_8 : i32
    %11 = arith.extui %10 : i1 to i32
    %c0_i32_9 = arith.constant 0 : i32
    %12 = arith.cmpi ne, %11, %c0_i32_9 : i32
    scf.if %12 {
      %c0_10 = arith.constant 0 : index
      %c0_11 = arith.constant 0 : index
      %13 = vector.load %arg7[%c0_10, %c0_11] : memref<16x64xf32, #tpu.memory_space<vmem>>, vector<16x64xf32>
      %c0_12 = arith.constant 0 : index
      %c0_13 = arith.constant 0 : index
      %14 = vector.load %arg5[%c0_12, %c0_13] : memref<1x64xf32, #tpu.memory_space<vmem>>, vector<1x64xf32>
      %15 = vector.broadcast %14 : vector<1x64xf32> to vector<16x64xf32>
      %16 = arith.addf %13, %15 : vector<16x64xf32>
      %cst_14 = arith.constant 0.000000e+00 : f32
      %17 = vector.broadcast %cst_14 : f32 to vector<16x64xf32>
      %18 = arith.maximumf %16, %17 : vector<16x64xf32>
      %19 = arith.truncf %18 : vector<16x64xf32> to vector<16x64xbf16>
      %c0_15 = arith.constant 0 : index
      %c0_16 = arith.constant 0 : index
      %20 = vector.load %arg6[%c0_15, %c0_16] : memref<16x64xbf16, #tpu.memory_space<vmem>>, vector<16x64xbf16>
      tpu.vector_store %arg6[%c0_15, %c0_16], %19 {strides = array<i32>} : memref<16x64xbf16, #tpu.memory_space<vmem>>, vector<16x64xbf16>,
    } else {
    }
    return
  }
  func.func @transform_0(%arg0: i32, %arg1: i32, %arg2: i32) -> (i32, i32) {
    %c0_i32 = arith.constant 0 : i32
    return %arg0, %arg2 : i32, i32
  }
  func.func @transform_1(%arg0: i32, %arg1: i32, %arg2: i32) -> (i32, i32) {
    %c0_i32 = arith.constant 0 : i32
    return %arg2, %arg1 : i32, i32
  }
  func.func @transform_2(%arg0: i32, %arg1: i32, %arg2: i32) -> (i32, i32) {
    %c0_i32 = arith.constant 0 : i32
    %c0_i32_0 = arith.constant 0 : i32
    return %c0_i32, %arg1 : i32, i32
  }
  func.func @transform_3(%arg0: i32, %arg1: i32, %arg2: i32) -> (i32, i32) {
    %c0_i32 = arith.constant 0 : i32
    return %arg0, %arg1 : i32, i32
  }
}

module attributes {stable_mosaic.version = 11 : i64} {
  func.func @_matmul_add_ln_kernel(%arg0: i32, %arg1: i32, %arg2: memref<16x64xbf16, #tpu.memory_space<vmem>>, %arg3: memref<64x32xbf16, #tpu.memory_space<vmem>>, %arg4: memref<1x32xf32, #tpu.memory_space<vmem>>, %arg5: memref<16x32xf32, #tpu.memory_space<vmem>>, %arg6: memref<1x32xf32, #tpu.memory_space<vmem>>, %arg7: memref<1x32xf32, #tpu.memory_space<vmem>>, %arg8: memref<16x32xf32, #tpu.memory_space<vmem>>, %arg9: memref<16x32xf32, #tpu.memory_space<vmem>>) attributes {dimension_semantics = [#tpu.dimension_semantics<parallel>, #tpu.dimension_semantics<arbitrary>], iteration_bounds = array<i64: 1, 1>, scalar_prefetch = 0 : i64, scratch_operands = 1 : i64, tpu.core_type = #tpu.core_type<tc>, window_params = [{transform_indices = @transform_0, window_bounds = array<i64: 16, 64>}, {transform_indices = @transform_1, window_bounds = array<i64: 64, 32>}, {pipeline_mode = #tpu.pipeline_mode<synchronous>, transform_indices = @transform_2, window_bounds = array<i64: 1, 32>}, {transform_indices = @transform_3, window_bounds = array<i64: 16, 32>}, {pipeline_mode = #tpu.pipeline_mode<synchronous>, transform_indices = @transform_4, window_bounds = array<i64: 1, 32>}, {pipeline_mode = #tpu.pipeline_mode<synchronous>, transform_indices = @transform_5, window_bounds = array<i64: 1, 32>}, {transform_indices = @transform_6, window_bounds = array<i64: 16, 32>}]} {
    %c0_i32 = arith.constant 0 : i32
    %0 = arith.cmpi eq, %arg1, %c0_i32 : i32
    %1 = arith.extui %0 : i1 to i32
    %c0_i32_0 = arith.constant 0 : i32
    %2 = arith.cmpi ne, %1, %c0_i32_0 : i32
    scf.if %2 {
      %cst_10 = arith.constant 0.000000e+00 : f32
      %12 = vector.broadcast %cst_10 : f32 to vector<16x32xf32>
      %c0_11 = arith.constant 0 : index
      %c0_12 = arith.constant 0 : index
      %13 = vector.load %arg9[%c0_11, %c0_12] : memref<16x32xf32, #tpu.memory_space<vmem>>, vector<16x32xf32>
      tpu.vector_store %arg9[%c0_11, %c0_12], %12 {strides = array<i32>} : memref<16x32xf32, #tpu.memory_space<vmem>>, vector<16x32xf32>,
    } else {
    }
    %c0 = arith.constant 0 : index
    %c0_1 = arith.constant 0 : index
    %3 = vector.load %arg9[%c0, %c0_1] : memref<16x32xf32, #tpu.memory_space<vmem>>, vector<16x32xf32>
    %c0_2 = arith.constant 0 : index
    %c0_3 = arith.constant 0 : index
    %4 = vector.load %arg2[%c0_2, %c0_3] : memref<16x64xbf16, #tpu.memory_space<vmem>>, vector<16x64xbf16>
    %c0_4 = arith.constant 0 : index
    %c0_5 = arith.constant 0 : index
    %5 = vector.load %arg3[%c0_4, %c0_5] : memref<64x32xbf16, #tpu.memory_space<vmem>>, vector<64x32xbf16>
    %cst = arith.constant dense<0.000000e+00> : vector<16x32xf32>
    %6 = tpu.matmul %4, %5, %cst {dimension_numbers = #tpu.dot_dimension_numbers<[1], [0], [0], [1], [0, 0, 1, 1], [], []>} : vector<16x64xbf16>, vector<64x32xbf16>, vector<16x32xf32> -> vector<16x32xf32>
    %7 = arith.addf %3, %6 : vector<16x32xf32>
    %c0_6 = arith.constant 0 : index
    %c0_7 = arith.constant 0 : index
    %8 = vector.load %arg9[%c0_6, %c0_7] : memref<16x32xf32, #tpu.memory_space<vmem>>, vector<16x32xf32>
    tpu.vector_store %arg9[%c0_6, %c0_7], %7 {strides = array<i32>} : memref<16x32xf32, #tpu.memory_space<vmem>>, vector<16x32xf32>,
    %c0_i32_8 = arith.constant 0 : i32
    %9 = arith.cmpi eq, %arg1, %c0_i32_8 : i32
    %10 = arith.extui %9 : i1 to i32
    %c0_i32_9 = arith.constant 0 : i32
    %11 = arith.cmpi ne, %10, %c0_i32_9 : i32
    scf.if %11 {
      %c0_10 = arith.constant 0 : index
      %c0_11 = arith.constant 0 : index
      %12 = vector.load %arg9[%c0_10, %c0_11] : memref<16x32xf32, #tpu.memory_space<vmem>>, vector<16x32xf32>
      %c0_12 = arith.constant 0 : index
      %c0_13 = arith.constant 0 : index
      %13 = vector.load %arg4[%c0_12, %c0_13] : memref<1x32xf32, #tpu.memory_space<vmem>>, vector<1x32xf32>
      %14 = vector.broadcast %13 : vector<1x32xf32> to vector<16x32xf32>
      %15 = arith.addf %12, %14 : vector<16x32xf32>
      %c0_14 = arith.constant 0 : index
      %c0_15 = arith.constant 0 : index
      %16 = vector.load %arg5[%c0_14, %c0_15] : memref<16x32xf32, #tpu.memory_space<vmem>>, vector<16x32xf32>
      %17 = arith.addf %15, %16 : vector<16x32xf32>
      %cst_16 = arith.constant dense<0.000000e+00> : vector<16xf32>
      %18 = vector.multi_reduction <add>, %17, %cst_16 [1] : vector<16x32xf32> to vector<16xf32>
      %19 = vector.shape_cast %18 : vector<16xf32> to vector<16x1xf32>
      %cst_17 = arith.constant 3.200000e+01 : f32
      %20 = vector.broadcast %cst_17 : f32 to vector<16x1xf32>
      %21 = arith.divf %19, %20 : vector<16x1xf32>
      %22 = vector.broadcast %21 : vector<16x1xf32> to vector<16x32xf32>
      %23 = arith.subf %17, %22 : vector<16x32xf32>
      %24 = arith.mulf %23, %23 : vector<16x32xf32>
      %cst_18 = arith.constant dense<0.000000e+00> : vector<16xf32>
      %25 = vector.multi_reduction <add>, %24, %cst_18 [1] : vector<16x32xf32> to vector<16xf32>
      %26 = vector.shape_cast %25 : vector<16xf32> to vector<16x1xf32>
      %cst_19 = arith.constant 3.200000e+01 : f32
      %27 = vector.broadcast %cst_19 : f32 to vector<16x1xf32>
      %28 = arith.divf %26, %27 : vector<16x1xf32>
      %29 = vector.broadcast %21 : vector<16x1xf32> to vector<16x32xf32>
      %30 = arith.subf %17, %29 : vector<16x32xf32>
      %cst_20 = arith.constant 9.99999974E-6 : f32
      %31 = vector.broadcast %cst_20 : f32 to vector<16x1xf32>
      %32 = arith.addf %28, %31 : vector<16x1xf32>
      %33 = math.rsqrt %32 : vector<16x1xf32>
      %34 = vector.broadcast %33 : vector<16x1xf32> to vector<16x32xf32>
      %35 = arith.mulf %30, %34 : vector<16x32xf32>
      %c0_21 = arith.constant 0 : index
      %c0_22 = arith.constant 0 : index
      %36 = vector.load %arg6[%c0_21, %c0_22] : memref<1x32xf32, #tpu.memory_space<vmem>>, vector<1x32xf32>
      %37 = vector.broadcast %36 : vector<1x32xf32> to vector<16x32xf32>
      %38 = arith.mulf %35, %37 : vector<16x32xf32>
      %c0_23 = arith.constant 0 : index
      %c0_24 = arith.constant 0 : index
      %39 = vector.load %arg7[%c0_23, %c0_24] : memref<1x32xf32, #tpu.memory_space<vmem>>, vector<1x32xf32>
      %40 = vector.broadcast %39 : vector<1x32xf32> to vector<16x32xf32>
      %41 = arith.addf %38, %40 : vector<16x32xf32>
      %c0_25 = arith.constant 0 : index
      %c0_26 = arith.constant 0 : index
      %42 = vector.load %arg8[%c0_25, %c0_26] : memref<16x32xf32, #tpu.memory_space<vmem>>, vector<16x32xf32>
      tpu.vector_store %arg8[%c0_25, %c0_26], %41 {strides = array<i32>} : memref<16x32xf32, #tpu.memory_space<vmem>>, vector<16x32xf32>,
    } else {
    }
    return
  }
  func.func @transform_0(%arg0: i32, %arg1: i32) -> (i32, i32) {
    %c0_i32 = arith.constant 0 : i32
    return %arg0, %arg1 : i32, i32
  }
  func.func @transform_1(%arg0: i32, %arg1: i32) -> (i32, i32) {
    %c0_i32 = arith.constant 0 : i32
    %c0_i32_0 = arith.constant 0 : i32
    return %arg1, %c0_i32 : i32, i32
  }
  func.func @transform_2(%arg0: i32, %arg1: i32) -> (i32, i32) {
    %c0_i32 = arith.constant 0 : i32
    %c0_i32_0 = arith.constant 0 : i32
    %c0_i32_1 = arith.constant 0 : i32
    return %c0_i32, %c0_i32_0 : i32, i32
  }
  func.func @transform_3(%arg0: i32, %arg1: i32) -> (i32, i32) {
    %c0_i32 = arith.constant 0 : i32
    %c0_i32_0 = arith.constant 0 : i32
    return %arg0, %c0_i32 : i32, i32
  }
  func.func @transform_4(%arg0: i32, %arg1: i32) -> (i32, i32) {
    %c0_i32 = arith.constant 0 : i32
    %c0_i32_0 = arith.constant 0 : i32
    %c0_i32_1 = arith.constant 0 : i32
    return %c0_i32, %c0_i32_0 : i32, i32
  }
  func.func @transform_5(%arg0: i32, %arg1: i32) -> (i32, i32) {
    %c0_i32 = arith.constant 0 : i32
    %c0_i32_0 = arith.constant 0 : i32
    %c0_i32_1 = arith.constant 0 : i32
    return %c0_i32, %c0_i32_0 : i32, i32
  }
  func.func @transform_6(%arg0: i32, %arg1: i32) -> (i32, i32) {
    %c0_i32 = arith.constant 0 : i32
    %c0_i32_0 = arith.constant 0 : i32
    return %arg0, %c0_i32 : i32, i32
  }
}

module attributes {stable_mosaic.version = 11 : i64} {
  func.func @_matmul_bias_kernel(%arg0: i32, %arg1: i32, %arg2: i32, %arg3: memref<16x32xf32, #tpu.memory_space<vmem>>, %arg4: memref<32x64xbf16, #tpu.memory_space<vmem>>, %arg5: memref<1x64xf32, #tpu.memory_space<vmem>>, %arg6: memref<16x64xbf16, #tpu.memory_space<vmem>>, %arg7: memref<16x64xf32, #tpu.memory_space<vmem>>) attributes {dimension_semantics = [#tpu.dimension_semantics<parallel>, #tpu.dimension_semantics<parallel>, #tpu.dimension_semantics<arbitrary>], iteration_bounds = array<i64: 1, 1, 1>, scalar_prefetch = 0 : i64, scratch_operands = 1 : i64, tpu.core_type = #tpu.core_type<tc>, window_params = [{transform_indices = @transform_0, window_bounds = array<i64: 16, 32>}, {transform_indices = @transform_1, window_bounds = array<i64: 32, 64>}, {transform_indices = @transform_2, window_bounds = array<i64: 1, 64>}, {transform_indices = @transform_3, window_bounds = array<i64: 16, 64>}]} {
    %c0_i32 = arith.constant 0 : i32
    %0 = arith.cmpi eq, %arg2, %c0_i32 : i32
    %1 = arith.extui %0 : i1 to i32
    %c0_i32_0 = arith.constant 0 : i32
    %2 = arith.cmpi ne, %1, %c0_i32_0 : i32
    scf.if %2 {
      %cst_10 = arith.constant 0.000000e+00 : f32
      %13 = vector.broadcast %cst_10 : f32 to vector<16x64xf32>
      %c0_11 = arith.constant 0 : index
      %c0_12 = arith.constant 0 : index
      %14 = vector.load %arg7[%c0_11, %c0_12] : memref<16x64xf32, #tpu.memory_space<vmem>>, vector<16x64xf32>
      tpu.vector_store %arg7[%c0_11, %c0_12], %13 {strides = array<i32>} : memref<16x64xf32, #tpu.memory_space<vmem>>, vector<16x64xf32>,
    } else {
    }
    %c0 = arith.constant 0 : index
    %c0_1 = arith.constant 0 : index
    %3 = vector.load %arg7[%c0, %c0_1] : memref<16x64xf32, #tpu.memory_space<vmem>>, vector<16x64xf32>
    %c0_2 = arith.constant 0 : index
    %c0_3 = arith.constant 0 : index
    %4 = vector.load %arg3[%c0_2, %c0_3] : memref<16x32xf32, #tpu.memory_space<vmem>>, vector<16x32xf32>
    %5 = arith.truncf %4 : vector<16x32xf32> to vector<16x32xbf16>
    %c0_4 = arith.constant 0 : index
    %c0_5 = arith.constant 0 : index
    %6 = vector.load %arg4[%c0_4, %c0_5] : memref<32x64xbf16, #tpu.memory_space<vmem>>, vector<32x64xbf16>
    %cst = arith.constant dense<0.000000e+00> : vector<16x64xf32>
    %7 = tpu.matmul %5, %6, %cst {dimension_numbers = #tpu.dot_dimension_numbers<[1], [0], [0], [1], [0, 0, 1, 1], [], []>} : vector<16x32xbf16>, vector<32x64xbf16>, vector<16x64xf32> -> vector<16x64xf32>
    %8 = arith.addf %3, %7 : vector<16x64xf32>
    %c0_6 = arith.constant 0 : index
    %c0_7 = arith.constant 0 : index
    %9 = vector.load %arg7[%c0_6, %c0_7] : memref<16x64xf32, #tpu.memory_space<vmem>>, vector<16x64xf32>
    tpu.vector_store %arg7[%c0_6, %c0_7], %8 {strides = array<i32>} : memref<16x64xf32, #tpu.memory_space<vmem>>, vector<16x64xf32>,
    %c0_i32_8 = arith.constant 0 : i32
    %10 = arith.cmpi eq, %arg2, %c0_i32_8 : i32
    %11 = arith.extui %10 : i1 to i32
    %c0_i32_9 = arith.constant 0 : i32
    %12 = arith.cmpi ne, %11, %c0_i32_9 : i32
    scf.if %12 {
      %c0_10 = arith.constant 0 : index
      %c0_11 = arith.constant 0 : index
      %13 = vector.load %arg7[%c0_10, %c0_11] : memref<16x64xf32, #tpu.memory_space<vmem>>, vector<16x64xf32>
      %c0_12 = arith.constant 0 : index
      %c0_13 = arith.constant 0 : index
      %14 = vector.load %arg5[%c0_12, %c0_13] : memref<1x64xf32, #tpu.memory_space<vmem>>, vector<1x64xf32>
      %15 = vector.broadcast %14 : vector<1x64xf32> to vector<16x64xf32>
      %16 = arith.addf %13, %15 : vector<16x64xf32>
      %17 = arith.truncf %16 : vector<16x64xf32> to vector<16x64xbf16>
      %c0_14 = arith.constant 0 : index
      %c0_15 = arith.constant 0 : index
      %18 = vector.load %arg6[%c0_14, %c0_15] : memref<16x64xbf16, #tpu.memory_space<vmem>>, vector<16x64xbf16>
      tpu.vector_store %arg6[%c0_14, %c0_15], %17 {strides = array<i32>} : memref<16x64xbf16, #tpu.memory_space<vmem>>, vector<16x64xbf16>,
    } else {
    }
    return
  }
  func.func @transform_0(%arg0: i32, %arg1: i32, %arg2: i32) -> (i32, i32) {
    %c0_i32 = arith.constant 0 : i32
    return %arg0, %arg2 : i32, i32
  }
  func.func @transform_1(%arg0: i32, %arg1: i32, %arg2: i32) -> (i32, i32) {
    %c0_i32 = arith.constant 0 : i32
    return %arg2, %arg1 : i32, i32
  }
  func.func @transform_2(%arg0: i32, %arg1: i32, %arg2: i32) -> (i32, i32) {
    %c0_i32 = arith.constant 0 : i32
    %c0_i32_0 = arith.constant 0 : i32
    return %c0_i32, %arg1 : i32, i32
  }
  func.func @transform_3(%arg0: i32, %arg1: i32, %arg2: i32) -> (i32, i32) {
    %c0_i32 = arith.constant 0 : i32
    return %arg0, %arg1 : i32, i32
  }
}

module attributes {stable_mosaic.version = 11 : i64} {
  func.func @_matmul_bias_kernel(%arg0: i32, %arg1: i32, %arg2: i32, %arg3: memref<16x32xf32, #tpu.memory_space<vmem>>, %arg4: memref<32x32xbf16, #tpu.memory_space<vmem>>, %arg5: memref<1x32xf32, #tpu.memory_space<vmem>>, %arg6: memref<16x32xbf16, #tpu.memory_space<vmem>>, %arg7: memref<16x32xf32, #tpu.memory_space<vmem>>) attributes {dimension_semantics = [#tpu.dimension_semantics<parallel>, #tpu.dimension_semantics<parallel>, #tpu.dimension_semantics<arbitrary>], iteration_bounds = array<i64: 1, 1, 1>, scalar_prefetch = 0 : i64, scratch_operands = 1 : i64, tpu.core_type = #tpu.core_type<tc>, window_params = [{transform_indices = @transform_0, window_bounds = array<i64: 16, 32>}, {transform_indices = @transform_1, window_bounds = array<i64: 32, 32>}, {transform_indices = @transform_2, window_bounds = array<i64: 1, 32>}, {transform_indices = @transform_3, window_bounds = array<i64: 16, 32>}]} {
    %c0_i32 = arith.constant 0 : i32
    %0 = arith.cmpi eq, %arg2, %c0_i32 : i32
    %1 = arith.extui %0 : i1 to i32
    %c0_i32_0 = arith.constant 0 : i32
    %2 = arith.cmpi ne, %1, %c0_i32_0 : i32
    scf.if %2 {
      %cst_10 = arith.constant 0.000000e+00 : f32
      %13 = vector.broadcast %cst_10 : f32 to vector<16x32xf32>
      %c0_11 = arith.constant 0 : index
      %c0_12 = arith.constant 0 : index
      %14 = vector.load %arg7[%c0_11, %c0_12] : memref<16x32xf32, #tpu.memory_space<vmem>>, vector<16x32xf32>
      tpu.vector_store %arg7[%c0_11, %c0_12], %13 {strides = array<i32>} : memref<16x32xf32, #tpu.memory_space<vmem>>, vector<16x32xf32>,
    } else {
    }
    %c0 = arith.constant 0 : index
    %c0_1 = arith.constant 0 : index
    %3 = vector.load %arg7[%c0, %c0_1] : memref<16x32xf32, #tpu.memory_space<vmem>>, vector<16x32xf32>
    %c0_2 = arith.constant 0 : index
    %c0_3 = arith.constant 0 : index
    %4 = vector.load %arg3[%c0_2, %c0_3] : memref<16x32xf32, #tpu.memory_space<vmem>>, vector<16x32xf32>
    %5 = arith.truncf %4 : vector<16x32xf32> to vector<16x32xbf16>
    %c0_4 = arith.constant 0 : index
    %c0_5 = arith.constant 0 : index
    %6 = vector.load %arg4[%c0_4, %c0_5] : memref<32x32xbf16, #tpu.memory_space<vmem>>, vector<32x32xbf16>
    %cst = arith.constant dense<0.000000e+00> : vector<16x32xf32>
    %7 = tpu.matmul %5, %6, %cst {dimension_numbers = #tpu.dot_dimension_numbers<[1], [0], [0], [1], [0, 0, 1, 1], [], []>} : vector<16x32xbf16>, vector<32x32xbf16>, vector<16x32xf32> -> vector<16x32xf32>
    %8 = arith.addf %3, %7 : vector<16x32xf32>
    %c0_6 = arith.constant 0 : index
    %c0_7 = arith.constant 0 : index
    %9 = vector.load %arg7[%c0_6, %c0_7] : memref<16x32xf32, #tpu.memory_space<vmem>>, vector<16x32xf32>
    tpu.vector_store %arg7[%c0_6, %c0_7], %8 {strides = array<i32>} : memref<16x32xf32, #tpu.memory_space<vmem>>, vector<16x32xf32>,
    %c0_i32_8 = arith.constant 0 : i32
    %10 = arith.cmpi eq, %arg2, %c0_i32_8 : i32
    %11 = arith.extui %10 : i1 to i32
    %c0_i32_9 = arith.constant 0 : i32
    %12 = arith.cmpi ne, %11, %c0_i32_9 : i32
    scf.if %12 {
      %c0_10 = arith.constant 0 : index
      %c0_11 = arith.constant 0 : index
      %13 = vector.load %arg7[%c0_10, %c0_11] : memref<16x32xf32, #tpu.memory_space<vmem>>, vector<16x32xf32>
      %c0_12 = arith.constant 0 : index
      %c0_13 = arith.constant 0 : index
      %14 = vector.load %arg5[%c0_12, %c0_13] : memref<1x32xf32, #tpu.memory_space<vmem>>, vector<1x32xf32>
      %15 = vector.broadcast %14 : vector<1x32xf32> to vector<16x32xf32>
      %16 = arith.addf %13, %15 : vector<16x32xf32>
      %17 = arith.truncf %16 : vector<16x32xf32> to vector<16x32xbf16>
      %c0_14 = arith.constant 0 : index
      %c0_15 = arith.constant 0 : index
      %18 = vector.load %arg6[%c0_14, %c0_15] : memref<16x32xbf16, #tpu.memory_space<vmem>>, vector<16x32xbf16>
      tpu.vector_store %arg6[%c0_14, %c0_15], %17 {strides = array<i32>} : memref<16x32xbf16, #tpu.memory_space<vmem>>, vector<16x32xbf16>,
    } else {
    }
    return
  }
  func.func @transform_0(%arg0: i32, %arg1: i32, %arg2: i32) -> (i32, i32) {
    %c0_i32 = arith.constant 0 : i32
    return %arg0, %arg2 : i32, i32
  }
  func.func @transform_1(%arg0: i32, %arg1: i32, %arg2: i32) -> (i32, i32) {
    %c0_i32 = arith.constant 0 : i32
    return %arg2, %arg1 : i32, i32
  }
  func.func @transform_2(%arg0: i32, %arg1: i32, %arg2: i32) -> (i32, i32) {
    %c0_i32 = arith.constant 0 : i32
    %c0_i32_0 = arith.constant 0 : i32
    return %c0_i32, %arg1 : i32, i32
  }
  func.func @transform_3(%arg0: i32, %arg1: i32, %arg2: i32) -> (i32, i32) {
    %c0_i32 = arith.constant 0 : i32
    return %arg0, %arg1 : i32, i32
  }
}

module attributes {stable_mosaic.version = 11 : i64} {
  func.func @_matmul_bias_kernel(%arg0: i32, %arg1: i32, %arg2: i32, %arg3: memref<16x32xf32, #tpu.memory_space<vmem>>, %arg4: memref<32x64xbf16, #tpu.memory_space<vmem>>, %arg5: memref<1x64xf32, #tpu.memory_space<vmem>>, %arg6: memref<16x64xf32, #tpu.memory_space<vmem>>, %arg7: memref<16x64xf32, #tpu.memory_space<vmem>>) attributes {dimension_semantics = [#tpu.dimension_semantics<parallel>, #tpu.dimension_semantics<parallel>, #tpu.dimension_semantics<arbitrary>], iteration_bounds = array<i64: 1, 1, 1>, scalar_prefetch = 0 : i64, scratch_operands = 1 : i64, tpu.core_type = #tpu.core_type<tc>, window_params = [{transform_indices = @transform_0, window_bounds = array<i64: 16, 32>}, {transform_indices = @transform_1, window_bounds = array<i64: 32, 64>}, {transform_indices = @transform_2, window_bounds = array<i64: 1, 64>}, {transform_indices = @transform_3, window_bounds = array<i64: 16, 64>}]} {
    %c0_i32 = arith.constant 0 : i32
    %0 = arith.cmpi eq, %arg2, %c0_i32 : i32
    %1 = arith.extui %0 : i1 to i32
    %c0_i32_0 = arith.constant 0 : i32
    %2 = arith.cmpi ne, %1, %c0_i32_0 : i32
    scf.if %2 {
      %cst_10 = arith.constant 0.000000e+00 : f32
      %13 = vector.broadcast %cst_10 : f32 to vector<16x64xf32>
      %c0_11 = arith.constant 0 : index
      %c0_12 = arith.constant 0 : index
      %14 = vector.load %arg7[%c0_11, %c0_12] : memref<16x64xf32, #tpu.memory_space<vmem>>, vector<16x64xf32>
      tpu.vector_store %arg7[%c0_11, %c0_12], %13 {strides = array<i32>} : memref<16x64xf32, #tpu.memory_space<vmem>>, vector<16x64xf32>,
    } else {
    }
    %c0 = arith.constant 0 : index
    %c0_1 = arith.constant 0 : index
    %3 = vector.load %arg7[%c0, %c0_1] : memref<16x64xf32, #tpu.memory_space<vmem>>, vector<16x64xf32>
    %c0_2 = arith.constant 0 : index
    %c0_3 = arith.constant 0 : index
    %4 = vector.load %arg3[%c0_2, %c0_3] : memref<16x32xf32, #tpu.memory_space<vmem>>, vector<16x32xf32>
    %5 = arith.truncf %4 : vector<16x32xf32> to vector<16x32xbf16>
    %c0_4 = arith.constant 0 : index
    %c0_5 = arith.constant 0 : index
    %6 = vector.load %arg4[%c0_4, %c0_5] : memref<32x64xbf16, #tpu.memory_space<vmem>>, vector<32x64xbf16>
    %cst = arith.constant dense<0.000000e+00> : vector<16x64xf32>
    %7 = tpu.matmul %5, %6, %cst {dimension_numbers = #tpu.dot_dimension_numbers<[1], [0], [0], [1], [0, 0, 1, 1], [], []>} : vector<16x32xbf16>, vector<32x64xbf16>, vector<16x64xf32> -> vector<16x64xf32>
    %8 = arith.addf %3, %7 : vector<16x64xf32>
    %c0_6 = arith.constant 0 : index
    %c0_7 = arith.constant 0 : index
    %9 = vector.load %arg7[%c0_6, %c0_7] : memref<16x64xf32, #tpu.memory_space<vmem>>, vector<16x64xf32>
    tpu.vector_store %arg7[%c0_6, %c0_7], %8 {strides = array<i32>} : memref<16x64xf32, #tpu.memory_space<vmem>>, vector<16x64xf32>,
    %c0_i32_8 = arith.constant 0 : i32
    %10 = arith.cmpi eq, %arg2, %c0_i32_8 : i32
    %11 = arith.extui %10 : i1 to i32
    %c0_i32_9 = arith.constant 0 : i32
    %12 = arith.cmpi ne, %11, %c0_i32_9 : i32
    scf.if %12 {
      %c0_10 = arith.constant 0 : index
      %c0_11 = arith.constant 0 : index
      %13 = vector.load %arg7[%c0_10, %c0_11] : memref<16x64xf32, #tpu.memory_space<vmem>>, vector<16x64xf32>
      %c0_12 = arith.constant 0 : index
      %c0_13 = arith.constant 0 : index
      %14 = vector.load %arg5[%c0_12, %c0_13] : memref<1x64xf32, #tpu.memory_space<vmem>>, vector<1x64xf32>
      %15 = vector.broadcast %14 : vector<1x64xf32> to vector<16x64xf32>
      %16 = arith.addf %13, %15 : vector<16x64xf32>
      %c0_14 = arith.constant 0 : index
      %c0_15 = arith.constant 0 : index
      %17 = vector.load %arg6[%c0_14, %c0_15] : memref<16x64xf32, #tpu.memory_space<vmem>>, vector<16x64xf32>
      tpu.vector_store %arg6[%c0_14, %c0_15], %16 {strides = array<i32>} : memref<16x64xf32, #tpu.memory_space<vmem>>, vector<16x64xf32>,
    } else {
    }
    return
  }
  func.func @transform_0(%arg0: i32, %arg1: i32, %arg2: i32) -> (i32, i32) {
    %c0_i32 = arith.constant 0 : i32
    return %arg0, %arg2 : i32, i32
  }
  func.func @transform_1(%arg0: i32, %arg1: i32, %arg2: i32) -> (i32, i32) {
    %c0_i32 = arith.constant 0 : i32
    return %arg2, %arg1 : i32, i32
  }
  func.func @transform_2(%arg0: i32, %arg1: i32, %arg2: i32) -> (i32, i32) {
    %c0_i32 = arith.constant 0 : i32
    %c0_i32_0 = arith.constant 0 : i32
    return %c0_i32, %arg1 : i32, i32
  }
  func.func @transform_3(%arg0: i32, %arg1: i32, %arg2: i32) -> (i32, i32) {
    %c0_i32 = arith.constant 0 : i32
    return %arg0, %arg1 : i32, i32
  }
}

</mosaic_0001>

<bundles_post_ra>
// kernel: transformer_forward.29
= control target key start
LH: loop header
LB: loop body
LE: loop exit
PB: predicated region body
PF: predicated region fallthrough
CT: control target
= control target key end

     0   :  { %vm19_vm0 = vcmask 785408   ;;  %v99_v1 = vmov 0.0   ;;  %vm43_vm1 = vcmask 261120   ;;  %vm79_vm2 = vcmask 781312   ;;  %s145_s1 = inlined_call_operand.vmem [shape: bf16[32,96], index: 1, kind: input, shape index: {}]   ;;  %s146_s0 = inlined_call_operand.vmem [shape: f32[16,32], index: 0, kind: input, shape index: {}]   ;;  %s147_s2 = inlined_call_operand.vmem [shape: f32[1,96], index: 2, kind: input, shape index: {}]   ;;  %s148_s3 = inlined_call_operand.vmem [shape: bf16[16,96], index: 3, kind: output, shape index: {}]  }
   0x1   :  { %v96_v0 = vld [vmem:[%s145_s1 + $0x8] sm:$0xff]  ;;  %20 = vst.msk [vmem:[#allocation2] sm:$0xff] %vm19_vm0, %v99_v1  ;;  %v95_v2 = vld [vmem:[%s145_s1] sm:$0xff] }
   0x2   :  { %21 = vst.msk [vmem:[#allocation2 + $0x8] sm:$0xff] %vm19_vm0, %v99_v1  ;;  %53 = vmatpush.bf16.msra.mxu0 %v96_v0  ;;  %v24_v3 = vld [vmem:[%s146_s0] sm:$0xff]  ;;  %v25_v4 = vld [vmem:[%s146_s0 + $0x8] sm:$0xff] }
   0x3   :  { %v26_v5 = vpack.c.bf16 %v25_v4, %v24_v3  ;;  %v98_v10 = vld [vmem:[%s147_s2] ss:$0 sm:$0xff] }
   0x6   :  { %54 = vmatpush.bf16.msra.mxu0 %v95_v2 }
   0x8   :  { %v22_v6 = vld [vmem:[#allocation2] sm:$0xff] }
   0x9   :  { %94 = vmatmul.msk.bf16.vlgmr.msra.gmra.mxu0 %vm43_vm1, %v26_v5  ;;  %v23_v9 = vld [vmem:[#allocation2 + $0x8] sm:$0xff] }
  0x86   :  { %v56_v7 = vpop.f32.mrf.mxu0 }
  0x87   :  { %v61_v8 = vadd.f32 %v56_v7, %v22_v6 }
  0x89   :  { %64 = vst.msk [vmem:[#allocation2] sm:$0xff] %vm19_vm0, %v61_v8 }
  0x8e   :  { %v58_v11 = vpop.f32.mrf.mxu0 }
  0x8f   :  { %v62_v12 = vadd.f32 %v58_v11, %v23_v9 }
  0x90   :  { %v69_v13 = vld [vmem:[#allocation2] sm:$0xff] }
  0x91   :  { %v75_v14 = vadd.f32 %v98_v10, %v69_v13  ;;  %65 = vst.msk [vmem:[#allocation2 + $0x8] sm:$0xff] %vm19_vm0, %v62_v12 }
  0x93   :  { %v77_v15 = vpack.c.bf16 %v75_v14, %v75_v14 }
  0x95   :  { %80 = vst.msk [vmem:[%s148_s3] sm:$0xf] %vm79_vm2, %v77_v15 }
  0x98   :  { %v70_v16 = vld [vmem:[#allocation2 + $0x8] sm:$0xff] }
  0x99   :  { %v76_v17 = vadd.f32 %v98_v10, %v70_v16 }
  0x9b   :  { %v78_v18 = vpack.c.bf16 %v76_v17, %v76_v17 }
  0x9d   :  { %81 = vst.msk [vmem:[%s148_s3 + $0x4] sm:$0xf] %vm79_vm2, %v78_v18 }

// kernel: transformer_forward.31
= control target key start
LH: loop header
LB: loop body
LE: loop exit
PB: predicated region body
PF: predicated region fallthrough
CT: control target
= control target key end

     0   :  { %vm28_vm0 = vcmask 261120   ;;  %v189_v1 = vmov 0.0   ;;  %v190_v21 = vmov 32.0   ;;  %s267_s1 = inlined_call_operand.vmem [shape: bf16[32,32], index: 1, kind: input, shape index: {}]   ;;  %s268_s0 = inlined_call_operand.vmem [shape: bf16[16,32], index: 0, kind: input, shape index: {}]   ;;  %s269_s2 = inlined_call_operand.vmem [shape: f32[1,32], index: 2, kind: input, shape index: {}]   ;;  %s270_s3 = inlined_call_operand.vmem [shape: f32[16,32], index: 3, kind: input, shape index: {}]   ;;  %s271_s4 = inlined_call_operand.vmem [shape: f32[1,32], index: 4, kind: input, shape index: {}]   ;;  %s272_s5 = inlined_call_operand.vmem [shape: f32[1,32], index: 5, kind: input, shape index: {}]   ;;  %s273_s6 = inlined_call_operand.vmem [shape: f32[16,32], index: 6, kind: output, shape index: {}]  }
   0x1   :  { %v177_v0 = vld [vmem:[%s267_s1 + $0x8] sm:$0xff]  ;;  %29 = vst.msk [vmem:[#allocation2] sm:$0xff] %vm28_vm0, %v189_v1  ;;  %v176_v2 = vld [vmem:[%s267_s1] sm:$0xff]  ;;  %183 = vrcp.f32 %v190_v21 }
   0x2   :  { %30 = vst.msk [vmem:[#allocation2 + $0x8] sm:$0xff] %vm28_vm0, %v189_v1  ;;  %66 = vmatpush.bf16.msra.mxu0 %v177_v0  ;;  %v175_v3 = vld [vmem:[%s268_s0] sm:$0xff]  ;;  %v90_v17 = vld [vmem:[%s270_s3 + $0x8] sm:$0xff] }
   0x3   :  { %v180_v8 = vld [vmem:[%s269_s2] ss:$0 sm:$0xff] }
   0x4   :  { %v89_v12 = vld [vmem:[%s270_s3] sm:$0xff] }
   0x5   :  { %v181_v52 = vld [vmem:[%s271_s4] ss:$0 sm:$0xff] }
   0x6   :  { %67 = vmatpush.bf16.msra.mxu0 %v176_v2  ;;  %v182_v55 = vld [vmem:[%s272_s5] ss:$0 sm:$0xff] }
   0x7   :  { %v184_v22 = vpop.eup %183 }
   0x8   :  { %v31_v4 = vld [vmem:[#allocation2] sm:$0xff]  ;;  %v100_v23 = vmul.f32 32.0, %v184_v22  ;;  %vm104_vm1 = vweird.f32 %v184_v22 }
   0x9   :  { %174 = vmatmul.msk.bf16.vlgmr.msra.gmra.mxu0 %vm28_vm0, %v175_v3  ;;  %v32_v7 = vld [vmem:[#allocation2 + $0x8] sm:$0xff] }
   0xa   :  { %v101_v24 = vsub.f32 1.0, %v100_v23 }
   0xc   :  { %v102_v25 = vmul.f32 %v184_v22, %v101_v24 }
   0xe   :  { %v103_v26 = vadd.f32 %v184_v22, %v102_v25 }
  0x10   :  { %v105_v27 = vsel %vm104_vm1, %v184_v22, %v103_v26 }
  0x86   :  { %v69_v5 = vpop.f32.mrf.mxu0 }
  0x87   :  { %v74_v6 = vadd.f32 %v69_v5, %v31_v4 }
  0x89   :  { %76 = vst.msk [vmem:[#allocation2] sm:$0xff] %vm28_vm0, %v74_v6 }
  0x8e   :  { %v71_v9 = vpop.f32.mrf.mxu0 }
  0x8f   :  { %v75_v10 = vadd.f32 %v71_v9, %v32_v7 }
  0x90   :  { %v81_v11 = vld [vmem:[#allocation2] sm:$0xff] }
  0x91   :  { %77 = vst.msk [vmem:[#allocation2 + $0x8] sm:$0xff] %vm28_vm0, %v75_v10  ;;  %v87_v13 = vadd.f32 %v180_v8, %v81_v11 }
  0x93   :  { %v91_v14 = vadd.f32 %v89_v12, %v87_v13 }
  0x95   :  { %v93_v15 = vsel %vm28_vm0, %v91_v14, 0.0 }
  0x96   :  { %94 = vadd.xlane.f32.xlu0 %v93_v15 }
  0x98   :  { %v82_v16 = vld [vmem:[#allocation2 + $0x8] sm:$0xff] }
  0x99   :  { %v88_v18 = vadd.f32 %v180_v8, %v82_v16 }
  0x9b   :  { %v92_v19 = vadd.f32 %v90_v17, %v88_v18 }
  0x9d   :  { %v96_v20 = vsel %vm28_vm0, %v92_v19, 0.0 }
  0x9e   :  { %97 = vadd.xlane.f32.xlu0 %v96_v20 }
 0x109   :  { %v95_v28 = vpop.xlane.xlu0 %94 }
 0x10a   :  { %v106_v29 = vmul.f32 %v105_v27, %v95_v28 }
 0x10c   :  { %v108_v30 = vsub.f32 %v91_v14, %v106_v29 }
 0x10e   :  { %v110_v31 = vmul.f32 %v108_v30, %v108_v30 }
 0x110   :  { %v112_v32 = vsel %vm28_vm0, %v110_v31, 0.0 }
 0x111   :  { %113 = vadd.xlane.f32.xlu1 %v112_v32  ;;  %v98_v33 = vpop.xlane.xlu0 %97 }
 0x112   :  { %v107_v34 = vmul.f32 %v105_v27, %v98_v33 }
 0x114   :  { %v109_v35 = vsub.f32 %v92_v19, %v107_v34 }
 0x116   :  { %v111_v36 = vmul.f32 %v109_v35, %v109_v35 }
 0x118   :  { %v115_v37 = vsel %vm28_vm0, %v111_v36, 0.0 }
 0x119   :  { %116 = vadd.xlane.f32.xlu1 %v115_v37 }
 0x184   :  { %v114_v38 = vpop.xlane.xlu1 %113 }
 0x185   :  { %v118_v39 = vmul.f32 %v114_v38, %v105_v27 }
 0x187   :  { %v120_v40 = vadd.f32 1e-05, %v118_v39 }
 0x189   :  { %185 = vrsqrt.f32 %v120_v40  ;;  %vm128_vm3 = vweird.f32 %v120_v40 }
 0x18c   :  { %v117_v41 = vpop.xlane.xlu1 %116 }
 0x18d   :  { %v119_v42 = vmul.f32 %v117_v41, %v105_v27 }
 0x18f   :  { %v186_v43 = vpop.eup %185  ;;  %v121_v44 = vadd.f32 1e-05, %v119_v42 }
 0x190   :  { %v123_v45 = vmul.f32 %v186_v43, %v120_v40  ;;  %vm129_vm2 = vweird.f32 %v186_v43 }
 0x191   :  { %187 = vrsqrt.f32 %v121_v44  ;;  %vm130_vm4 = vmor %vm128_vm3, %vm129_vm2  ;;  %vm138_vm6 = vweird.f32 %v121_v44 }
 0x192   :  { %v124_v46 = vmul.f32 %v186_v43, %v123_v45 }
 0x194   :  { %v125_v47 = vmul.f32 0.5, %v124_v46 }
 0x196   :  { %v126_v48 = vsub.f32 1.5, %v125_v47 }
 0x197   :  { %v188_v49 = vpop.eup %187 }
 0x198   :  { %v127_v50 = vmul.f32 %v186_v43, %v126_v48  ;;  %v133_v51 = vmul.f32 %v188_v49, %v121_v44  ;;  %vm139_vm5 = vweird.f32 %v188_v49 }
 0x199   :  { %vm140_vm7 = vmor %vm138_vm6, %vm139_vm5 }
 0x19a   :  { %v131_v53 = vsel %vm130_vm4, %v186_v43, %v127_v50  ;;  %v134_v54 = vmul.f32 %v188_v49, %v133_v51 }
 0x19b   :  { %v142_v56 = vmul.f32 %v131_v53, %v108_v30 }
 0x19c   :  { %v135_v57 = vmul.f32 0.5, %v134_v54 }
 0x19d   :  { %v148_v58 = vmul.f32 %v181_v52, %v142_v56 }
 0x19e   :  { %v136_v59 = vsub.f32 1.5, %v135_v57 }
 0x19f   :  { %v154_v60 = vadd.f32 %v182_v55, %v148_v58 }
 0x1a0   :  { %v137_v61 = vmul.f32 %v188_v49, %v136_v59 }
 0x1a1   :  { %156 = vst.msk [vmem:[%s273_s6] sm:$0xff] %vm28_vm0, %v154_v60 }
 0x1a2   :  { %v141_v62 = vsel %vm140_vm7, %v188_v49, %v137_v61 }
 0x1a3   :  { %v143_v63 = vmul.f32 %v141_v62, %v109_v35 }
 0x1a5   :  { %v149_v0 = vmul.f32 %v181_v52, %v143_v63 }
 0x1a7   :  { %v155_v1 = vadd.f32 %v182_v55, %v149_v0 }
 0x1a9   :  { %157 = vst.msk [vmem:[%s273_s6 + $0x8] sm:$0xff] %vm28_vm0, %v155_v1 }

// kernel: transformer_forward.32
= control target key start
LH: loop header
LB: loop body
LE: loop exit
PB: predicated region body
PF: predicated region fallthrough
CT: control target
= control target key end

     0   :  { %vm19_vm0 = vcmask 523264   ;;  %v101_v1 = vmov 0.0   ;;  %vm43_vm1 = vcmask 261120   ;;  %vm81_vm2 = vcmask 519168   ;;  %s147_s1 = inlined_call_operand.vmem [shape: bf16[32,64], index: 1, kind: input, shape index: {}]   ;;  %s148_s0 = inlined_call_operand.vmem [shape: f32[16,32], index: 0, kind: input, shape index: {}]   ;;  %s149_s2 = inlined_call_operand.vmem [shape: f32[1,64], index: 2, kind: input, shape index: {}]   ;;  %s150_s3 = inlined_call_operand.vmem [shape: bf16[16,64], index: 3, kind: output, shape index: {}]  }
   0x1   :  { %v98_v0 = vld [vmem:[%s147_s1 + $0x8] sm:$0xff]  ;;  %20 = vst.msk [vmem:[#allocation2] sm:$0xff] %vm19_vm0, %v101_v1  ;;  %v97_v2 = vld [vmem:[%s147_s1] sm:$0xff] }
   0x2   :  { %21 = vst.msk [vmem:[#allocation2 + $0x8] sm:$0xff] %vm19_vm0, %v101_v1  ;;  %53 = vmatpush.bf16.msra.mxu0 %v98_v0  ;;  %v24_v3 = vld [vmem:[%s148_s0] sm:$0xff]  ;;  %v25_v4 = vld [vmem:[%s148_s0 + $0x8] sm:$0xff] }
   0x3   :  { %v26_v5 = vpack.c.bf16 %v25_v4, %v24_v3  ;;  %v100_v10 = vld [vmem:[%s149_s2] ss:$0 sm:$0xff] }
   0x6   :  { %54 = vmatpush.bf16.msra.mxu0 %v97_v2 }
   0x8   :  { %v22_v6 = vld [vmem:[#allocation2] sm:$0xff] }
   0x9   :  { %96 = vmatmul.msk.bf16.vlgmr.msra.gmra.mxu0 %vm43_vm1, %v26_v5  ;;  %v23_v9 = vld [vmem:[#allocation2 + $0x8] sm:$0xff] }
  0x86   :  { %v56_v7 = vpop.f32.mrf.mxu0 }
  0x87   :  { %v61_v8 = vadd.f32 %v56_v7, %v22_v6 }
  0x89   :  { %64 = vst.msk [vmem:[#allocation2] sm:$0xff] %vm19_vm0, %v61_v8 }
  0x8e   :  { %v58_v11 = vpop.f32.mrf.mxu0 }
  0x8f   :  { %v62_v12 = vadd.f32 %v58_v11, %v23_v9 }
  0x90   :  { %v69_v13 = vld [vmem:[#allocation2] sm:$0xff] }
  0x91   :  { %v75_v14 = vadd.f32 %v100_v10, %v69_v13  ;;  %65 = vst.msk [vmem:[#allocation2 + $0x8] sm:$0xff] %vm19_vm0, %v62_v12 }
  0x93   :  { %v77_v15 = vmax.f32 %v75_v14, 0.0 }
  0x95   :  { %v79_v16 = vpack.c.bf16 %v77_v15, %v77_v15 }
  0x97   :  { %82 = vst.msk [vmem:[%s150_s3] sm:$0xf] %vm81_vm2, %v79_v16 }
  0x98   :  { %v70_v17 = vld [vmem:[#allocation2 + $0x8] sm:$0xff] }
  0x99   :  { %v76_v18 = vadd.f32 %v100_v10, %v70_v17 }
  0x9b   :  { %v78_v19 = vmax.f32 %v76_v18, 0.0 }
  0x9d   :  { %v80_v20 = vpack.c.bf16 %v78_v19, %v78_v19 }
  0x9f   :  { %83 = vst.msk [vmem:[%s150_s3 + $0x4] sm:$0xf] %vm81_vm2, %v80_v20 }

// kernel: transformer_forward.30
= control target key start
LH: loop header
LB: loop body
LE: loop exit
PB: predicated region body
PF: predicated region fallthrough
CT: control target
= control target key end

     0   :  { %s931_s12 = smov 0   ;;  %s933_s13 = smov 0   ;;  %s1098_s0 = inlined_call_operand.vmem [shape: bf16[2,8,32], index: 0, kind: input, shape index: {}]   ;;  %s1099_s1 = inlined_call_operand.vmem [shape: bf16[2,8,32], index: 1, kind: input, shape index: {}]   ;;  %s1100_s2 = inlined_call_operand.vmem [shape: bf16[2,8,32], index: 2, kind: input, shape index: {}]   ;;  %s1101_s3 = inlined_call_operand.vmem [shape: bf16[2,8,32], index: 3, kind: output, shape index: {}]  }
   0x1   :  { %s935_s14 = smov 0  }
   0x2 LB: > { %s32_s15 = sadd.s32 1, %s893_s13  ;;  %p793_p0 = scmp.ge.s32.totalorder %s897_s14, 1  ;;  %s897_s14 = sphi %s935_s14, %s13_s14   ;;  %s893_s13 = sphi %s933_s13, %s1103_s13   ;;  %s889_s12 = sphi %s931_s12, %s1102_s12  }
   0x3   : > { %p34_p1 = scmp.ge.s32.totalorder %s32_s15, 2  ;;  %p190_p2 = scmp.lt.s32.totalorder %s897_s14, 3 }
   0x5   : > { %s1105_s15 = smov (%p34_p1, %s32_s15), 0  ;;  %p191_p3 = pnand %p793_p0, %p190_p2 }
   0x6   : > { %p232_p4 = scmp.lt.s32.totalorder (!%p191_p3), %s889_s12, 1  ;;  %s901_s23 = smov (!%p191_p3), 120  }
   0x7   : > { %194 = sbr.rel (%p191_p3) target bundleno = 1207 (0x4b7), region = 32  ;;  %s903_s24 = smov (!%p191_p3), 112  }
   0x8   : > { %s904_s25 = smov (!%p191_p3), 104   ;;  %s908_s29 = smov (!%p191_p3), 8  }
   0x9   : > { %s909_s30 = smov (!%p191_p3), 16   ;;  %s910_s4 = smov (!%p191_p3), 24  }
   0xc   : > { %s1107_s12 = smov (!%p232_p4, %s889_s12), 1  ;;  %vm273_vm0 = vcmask 64512   ;;  %vm265_vm1 = vcmask 31744   ;;  %v899_v3 = vmov -inf   ;;  %v900_v11 = vmov 0  }
   0xd   : > { %s949_s16 = sshll.u32 %s1107_s12, 2  ;;  %266 = vst.msk [vmem:[#allocation2] sm:$0xff] %vm265_vm1, %v899_v3  ;;  %844 = vset.pattern.permute.xlu1 %v900_v11  ;;  %v902_v12 = vmov 0.0   ;;  %vm316_vm2 = vcmask 7168   ;;  %vm330_vm3 = vcmask 1043456   ;;  %v907_v3 = vmov 3  }
   0xe   : > { %s955_s19 = scalar_lea.vmem %s1099_s1, %s949_s16  ;;  %s963_s22 = scalar_lea.vmem %s1098_s0, %s949_s16  ;;  %267 = vst.msk [vmem:[#allocation3] sm:$0xff] %vm265_vm1, %v902_v12  ;;  %vm404_vm4 = vcmask 15368   ;;  %vm501_vm5 = vcmask 23568   ;;  %vm598_vm6 = vcmask 31768   ;;  %vm268_vm7 = vcmask 261120  }
   0xf   : > { %v271_v0 = vld [vmem:[%s955_s19] sm:$0xf]  ;;  %s999_s28 = scalar_lea.vmem %s1100_s2, %s949_s16  ;;  %269 = vst.msk [vmem:[#allocation4] sm:$0xff] %vm268_vm7, %v902_v12  ;;  %vm444_vm8 = vcmask 130112   ;;  %vm541_vm9 = vcmask 195712   ;;  %vm638_vm10 = vcmask 261312   ;;  %s259_s7 = scalar_lea.vmem %s1101_s3, %s949_s16 }
  0x10   : > { %v278_v1 = vsel %vm273_vm0, %v271_v0, 0  ;;  %v270_v2 = vld [vmem:[%s963_s22] sm:$0xf]  ;;  %vm653_vm11 = vcmask 60416   ;;  %vm662_vm12 = vcmask 126016   ;;  %vm671_vm13 = vcmask 191616  }
  0x11   : > { %287 = vmatpush.bf16.xpose.msra.mxu0 %v278_v1  ;;  %v350_v8 = vld [vmem:[%s955_s19] sm:$0xf]  ;;  %v905_v1 = vmov 1   ;;  %vm680_vm14 = vcmask 257216  }
  0x12   : > { %v358_v9 = vunpack.c.l.b16 %v350_v8  ;;  %v447_v13 = vld [vmem:[%s955_s19] sm:$0xf]  ;;  %845 = vset.pattern.permute.xlu2 %v905_v1 }
  0x13   : > { %v455_v14 = vunpack.c.l.b16 %v447_v13  ;;  %v446_v15 = vld [vmem:[%s963_s22] sm:$0xf] }
  0x14   : > { %v359_v10 = vpack.c.b16 %v358_v9, %v358_v9  ;;  %v450_v17 = vunpack.c.l.b16 %v446_v15  ;;  %v543_v19 = vld [vmem:[%s963_s22] sm:$0xf] }
  0x15   : > { %v456_v16 = vpack.c.b16 %v455_v14, %v455_v14  ;;  %v978_v20 = vld [vmem:[#allocation2] sm:$0xff]  ;;  %v547_v23 = vunpack.c.l.b16 %v543_v19 }
  0x16   : > { %v451_v18 = vpack.c.b16 %v450_v17, %v450_v17  ;;  %v349_v22 = vld [vmem:[%s963_s22] sm:$0xf] }
  0x17   : > { %457 = vrot.lane.b32.xlu2 %v456_v16, %s903_s24  ;;  %v353_v26 = vunpack.c.l.b16 %v349_v22  ;;  %v548_v27 = vpack.c.b16 %v547_v23, %v547_v23  ;;  %v544_v29 = vld [vmem:[%s955_s19] sm:$0xf] }
  0x18   : > { %798 = vmatmul.msk.bf16.vlgmr.msra.gmra.mxu0 %vm273_vm0, %v270_v2  ;;  %v552_v30 = vunpack.c.l.b16 %v544_v29  ;;  %v272_v34 = vld [vmem:[%s999_s28] sm:$0xf]  ;;  %v906_v2 = vmov 2  }
  0x19   : > { %v354_v28 = vpack.c.b16 %v353_v26, %v353_v26  ;;  %v332_v35 = vsel %vm330_vm3, %v272_v34, 0  ;;  %v351_v60 = vld [vmem:[%s999_s28] sm:$0xf]  ;;  %846 = vset.pattern.permute.xlu0 %v906_v2 }
  0x1a   : > { %v553_v31 = vpack.c.b16 %v552_v30, %v552_v30  ;;  %341 = vmatpush.bf16.msra.mxu1 %v332_v35  ;;  %v416_v62 = vunpack.c.l.b16 %v351_v60  ;;  %v295_v60 = vld [vmem:[#allocation3] sm:$0xff] }
  0x1c   : > { %v417_v0 = vpack.c.b16 %v416_v62, %v416_v62 }
  0x1f   : > { %452 = vrot.lane.b32.xlu2 %v451_v18, %s903_s24 }
  0x27   : > { %549 = vrot.lane.b32.xlu2 %v548_v27, %s904_s25 }
  0x71   : > { %v458_v36 = vpop.permute.xlu2 %457 }
  0x72   : > { %v463_v37 = vsel %vm273_vm0, %v458_v36, 0 }
  0x73   : > { %472 = vmatpush.bf16.xpose.msrb.mxu1 %v463_v37 }
  0x79   : > { %v453_v44 = vpop.permute.xlu2 %452 }
  0x81   : > { %v550_v47 = vpop.permute.xlu2 %549 }
  0x95   : > { %v289_v4 = vpop.f32.mrf.mxu0 }
  0x96   : > { %v293_v5 = vmul.f32 0.35355338, %v289_v4 }
  0x98   : > { %v296_v6 = vsel %vm273_vm0, %v293_v5, -inf }
  0x99   : > { %297 = vmax.xlane.f32.xlu0 %v296_v6  ;;  %v448_v6 = vld [vmem:[%s999_s28] sm:$0xf] }
  0x9a   : > { %v513_v8 = vunpack.c.l.b16 %v448_v6 }
  0x9c   : > { %v514_v9 = vpack.c.b16 %v513_v8, %v513_v8 }
  0x9d   : > { %v291_v7 = vpop.f32.mrf.mxu0 }
  0xad   : > { %360 = vrot.lane.b32.xlu0 %v359_v10, %s901_s23  ;;  %v545_v10 = vld [vmem:[%s999_s28] sm:$0xf] }
  0xae   : > { %v610_v13 = vunpack.c.l.b16 %v545_v10 }
  0xb0   : > { %v611_v16 = vpack.c.b16 %v610_v13, %v610_v13 }
 0x10c   : > { %v298_v21 = vpop.xlane.xlu0 %297 }
 0x10d   : > { %v983_v24 = vmax.f32 %v978_v20, %v298_v21 }
 0x10f   : > { %v300_v25 = vsub.f32 %v978_v20, %v983_v24  ;;  %318 = vst.msk [vmem:[#allocation2] sm:$0xff] %vm316_vm2, %v983_v24  ;;  %305 = vperm.xlu1 %844, %v983_v24  }
 0x111   : > { %v301_v17 = vmul.f32 1.442695, %v300_v25 }
 0x116   : > { %v382_v4 = vld [vmem:[#allocation2] sm:$0xff] }
 0x117   : > { %355 = vrot.lane.b32.xlu1 %v354_v28, %s901_s23 }
 0x118   : > { %847 = vset.pattern.permute.xlu1 %v907_v3 }
 0x11f   : > { %554 = vrot.lane.b32.xlu1 %v553_v31, %s904_s25  ;;  %v361_v32 = vpop.permute.xlu0 %360 }
 0x120   : > { %v366_v33 = vsel %vm273_vm0, %v361_v32, 0 }
 0x121   : > { %375 = vmatpush.bf16.xpose.msra.mxu2 %v366_v33 }
 0x181   : > { %v306_v38 = vpop.permute.xlu1 %305 }
 0x182   : > { %v308_v39 = vsub.f32 %v293_v5, %v306_v38 }
 0x184   : > { %v309_v40 = vmul.f32 1.442695, %v308_v39 }
 0x186   : > { %857 = vpow2.f32 %v309_v40 }
 0x187   : > { %859 = vpow2.f32 %v301_v17 }
 0x189   : > { %v356_v41 = vpop.permute.xlu1 %355 }
 0x18a   : > { %800 = vmatmul.msk.bf16.vlgmr.msra.gmra.mxu2 %vm273_vm0, %v356_v41 }
 0x18c   : > { %v1005_v42 = vpop.eup %857 }
 0x18d   : > { %v326_v43 = vpack.c.bf16 %v1005_v42, %v1005_v42  ;;  %v1041_v27 = vpop.eup %859  ;;  %v312_v25 = vsel %vm273_vm0, %v1005_v42, 0.0 }
 0x18f   : > { %799 = vmatmul.msk.bf16.vlgmr.msra.gmra.mxu1 %vm273_vm0, %v326_v43  ;;  %v319_v43 = vld [vmem:[#allocation4] sm:$0xff] }
 0x191   : > { %v555_v45 = vpop.permute.xlu1 %554 }
 0x192   : > { %v560_v46 = vsel %vm273_vm0, %v555_v45, 0 }
 0x193   : > { %569 = vmatpush.bf16.xpose.msrb.mxu0 %v560_v46 }
 0x19a   : > { %804 = vmatmul.msk.bf16.vlgmr.msrb.gmra.mxu0 %vm273_vm0, %v550_v47 }
 0x19f   : > { %802 = vmatmul.msk.bf16.vlgmr.msrb.gmra.mxu1 %vm273_vm0, %v453_v44 }
 0x20c   : > { %v1013_v48 = vpop.f32.mrf.mxu1 }
 0x20d   : > { %v377_v49 = vpop.f32.mrf.mxu2 }
 0x20e   : > { %v1015_v50 = vmul.f32 0.35355338, %v377_v49 }
 0x210   : > { %v384_v51 = vsel %vm273_vm0, %v1015_v50, -inf }
 0x211   : > { %385 = vmax.xlane.f32.xlu1 %v384_v51 }
 0x214   : > { %v345_v52 = vpop.f32.mrf.mxu1 }
 0x215   : > { %v379_v53 = vpop.f32.mrf.mxu2 }
 0x217   : > { %v571_v54 = vpop.f32.mrf.mxu0 }
 0x218   : > { %v1019_v55 = vmul.f32 0.35355338, %v571_v54 }
 0x21a   : > { %v578_v56 = vsel %vm273_vm0, %v1019_v55, -inf }
 0x21b   : > { %579 = vmax.xlane.f32.xlu0 %v578_v56 }
 0x21c   : > { %v474_v57 = vpop.f32.mrf.mxu1 }
 0x21d   : > { %v1023_v58 = vmul.f32 0.35355338, %v474_v57 }
 0x21f   : > { %v481_v59 = vsel %vm273_vm0, %v1023_v58, -inf  ;;  %v573_v61 = vpop.f32.mrf.mxu0 }
 0x220   : > { %482 = vmax.xlane.f32.xlu2 %v481_v59 }
 0x224   : > { %v476_v63 = vpop.f32.mrf.mxu1 }
 0x22a   : > { %418 = vrot.lane.b32.xlu1 %v417_v0, %s901_s23 }
 0x284   : > { %v386_v5 = vpop.xlane.xlu1 %385 }
 0x285   : > { %v387_v7 = vmax.f32 %v382_v4, %v386_v5 }
 0x287   : > { %406 = vst.msk [vmem:[#allocation2] sm:$0xff] %vm404_vm4, %v387_v7  ;;  %393 = vperm.xlu2 %845, %v387_v7   ;;  %v388_v21 = vsub.f32 %v382_v4, %v387_v7 }
 0x289   : > { %v389_v23 = vmul.f32 1.442695, %v388_v21 }
 0x28b   : > { %861 = vpow2.f32 %v389_v23 }
 0x28e   : > { %v479_v15 = vld [vmem:[#allocation2] sm:$0xff]  ;;  %v580_v22 = vpop.xlane.xlu0 %579 }
 0x28f   : > { %515 = vrot.lane.b32.xlu2 %v514_v9, %s903_s24 }
 0x290   : > { %848 = vset.pattern.permute.xlu2 %v900_v11 }
 0x291   : > { %v1045_v24 = vpop.eup %861 }
 0x293   : > { %v483_v14 = vpop.xlane.xlu2 %482 }
 0x294   : > { %v484_v18 = vmax.f32 %v479_v15, %v483_v14 }
 0x296   : > { %v485_v19 = vsub.f32 %v479_v15, %v484_v18  ;;  %503 = vst.msk [vmem:[#allocation2] sm:$0xff] %vm501_vm5, %v484_v18  ;;  %490 = vperm.xlu0 %846, %v484_v18  }
 0x297   : > { %612 = vrot.lane.b32.xlu2 %v611_v16, %s904_s25 }
 0x298   : > { %v486_v31 = vmul.f32 1.442695, %v485_v19 }
 0x29a   : > { %863 = vpow2.f32 %v486_v31 }
 0x29c   : > { %v419_v29 = vpop.permute.xlu1 %418 }
 0x29d   : > { %v576_v26 = vld [vmem:[#allocation2] sm:$0xff]  ;;  %v424_v30 = vsel %vm330_vm3, %v419_v29, 0 }
 0x29e   : > { %v581_v28 = vmax.f32 %v576_v26, %v580_v22  ;;  %853 = vset.pattern.permute.xlu0 %v905_v1  ;;  %433 = vmatpush.bf16.msra.mxu3 %v424_v30 }
 0x29f   : > { %322 = vperm.xlu2 %848, %v1041_v27  }
 0x2a0   : > { %v582_v20 = vsub.f32 %v576_v26, %v581_v28  ;;  %600 = vst.msk [vmem:[#allocation2] sm:$0xff] %vm598_vm6, %v581_v28  ;;  %587 = vperm.xlu1 %847, %v581_v28   ;;  %v1053_v34 = vpop.eup %863 }
 0x2a2   : > { %v583_v32 = vmul.f32 1.442695, %v582_v20 }
 0x2a4   : > { %865 = vpow2.f32 %v583_v32 }
 0x2a7   : > { %849 = vset.pattern.permute.xlu2 %v905_v1 }
 0x2a8   : > { %410 = vperm.xlu2 %849, %v1045_v24   ;;  %850 = vset.pattern.permute.xlu1 %v906_v2 }
 0x2aa   : > { %v1057_v38 = vpop.eup %865 }
 0x2ca   : > { %313 = vadd.xlane.f32.xlu1 %v312_v25 }
 0x2e1   : > { %v394_v33 = vpop.permute.xlu2 %393 }
 0x2e2   : > { %v396_v35 = vsub.f32 %v1015_v50, %v394_v33 }
 0x2e3   : > { %507 = vperm.xlu1 %850, %v1053_v34  }
 0x2e4   : > { %v397_v36 = vmul.f32 1.442695, %v396_v35 }
 0x2e6   : > { %867 = vpow2.f32 %v397_v36 }
 0x2e9   : > { %v516_v37 = vpop.permute.xlu2 %515 }
 0x2ea   : > { %v521_v42 = vsel %vm330_vm3, %v516_v37, 0 }
 0x2eb   : > { %851 = vset.pattern.permute.xlu1 %v907_v3  ;;  %530 = vmatpush.bf16.msrb.mxu3 %v521_v42 }
 0x2ec   : > { %v868_v39 = vpop.eup %867  ;;  %604 = vperm.xlu1 %851, %v1057_v38  }
 0x2ed   : > { %v400_v12 = vsel %vm273_vm0, %v868_v39, 0.0  ;;  %v414_v40 = vpack.c.bf16 %v868_v39, %v868_v39 }
 0x2ee   : > { %401 = vadd.xlane.f32.xlu0 %v400_v12 }
 0x2ef   : > { %801 = vmatmul.msk.bf16.vlgmr.msra.gmra.mxu3 %vm273_vm0, %v414_v40 }
 0x2f1   : > { %v613_v41 = vpop.permute.xlu2 %612 }
 0x2f2   : > { %v618_v44 = vsel %vm330_vm3, %v613_v41, 0 }
 0x2f3   : > { %627 = vmatpush.bf16.msrb.mxu2 %v618_v44 }
 0x2f4   : > { %852 = vset.pattern.permute.xlu1 %v900_v11 }
 0x2f9   : > { %v323_v45 = vpop.permute.xlu2 %322 }
 0x2fa   : > { %v325_v46 = vmul.f32 %v323_v45, %v319_v43 }
 0x2fc   : > { %v347_v47 = vadd.f32 %v1013_v48, %v325_v46 }
 0x2fe   : > { %348 = vst.msk [vmem:[#allocation4] sm:$0xff] %vm273_vm0, %v347_v47 }
 0x302   : > { %v411_v13 = vpop.permute.xlu2 %410 }
 0x305   : > { %v407_v14 = vld [vmem:[#allocation4] sm:$0xff] }
 0x306   : > { %v413_v15 = vmul.f32 %v411_v13, %v407_v14 }
 0x308   : > { %v491_v49 = vpop.permute.xlu0 %490 }
 0x309   : > { %v493_v50 = vsub.f32 %v1023_v58, %v491_v49  ;;  %v311_v58 = vmul.f32 %v1041_v27, %v295_v60 }
 0x30b   : > { %v494_v51 = vmul.f32 1.442695, %v493_v50 }
 0x30d   : > { %869 = vpow2.f32 %v494_v51 }
 0x312   : > { %v588_v52 = vpop.permute.xlu1 %587 }
 0x313   : > { %v870_v53 = vpop.eup %869  ;;  %v590_v54 = vsub.f32 %v1019_v55, %v588_v52 }
 0x314   : > { %v511_v11 = vpack.c.bf16 %v870_v53, %v870_v53  ;;  %v497_v7 = vsel %vm273_vm0, %v870_v53, 0.0 }
 0x315   : > { %v591_v56 = vmul.f32 1.442695, %v590_v54 }
 0x316   : > { %803 = vmatmul.msk.bf16.vlgmr.msrb.gmra.mxu3 %vm273_vm0, %v511_v11 }
 0x317   : > { %871 = vpow2.f32 %v591_v56 }
 0x31d   : > { %v872_v57 = vpop.eup %871 }
 0x31e   : > { %v594_v59 = vsel %vm273_vm0, %v872_v57, 0.0  ;;  %v608_v48 = vpack.c.bf16 %v872_v57, %v872_v57 }
 0x31f   : > { %595 = vadd.xlane.f32.xlu0 %v594_v59 }
 0x320   : > { %805 = vmatmul.msk.bf16.vlgmr.msrb.gmra.mxu2 %vm273_vm0, %v608_v48 }
 0x33d   : > { %v314_v61 = vpop.xlane.xlu1 %313 }
 0x33e   : > { %v315_v62 = vadd.f32 %v314_v61, %v311_v58 }
 0x340   : > { %317 = vst.msk [vmem:[#allocation3] sm:$0xff] %vm316_vm2, %v315_v62 }
 0x347   : > { %v383_v55 = vld [vmem:[#allocation3] sm:$0xff] }
 0x348   : > { %v399_v63 = vmul.f32 %v1045_v24, %v383_v55 }
 0x355   : > { %v508_v21 = vpop.permute.xlu1 %507 }
 0x35e   : > { %v605_v25 = vpop.permute.xlu1 %604 }
 0x361   : > { %v402_v0 = vpop.xlane.xlu0 %401 }
 0x362   : > { %v403_v1 = vadd.f32 %v402_v0, %v399_v63 }
 0x364   : > { %405 = vst.msk [vmem:[#allocation3] sm:$0xff] %vm404_vm4, %v403_v1 }
 0x36b   : > { %v480_v23 = vld [vmem:[#allocation3] sm:$0xff] }
 0x36c   : > { %v496_v28 = vmul.f32 %v1053_v34, %v480_v23 }
 0x372   : > { %v435_v4 = vpop.f32.mrf.mxu3 }
 0x373   : > { %440 = vrot.lane.b32.xlu2 %v435_v4, %s908_s29 }
 0x37a   : > { %v437_v5 = vpop.f32.mrf.mxu3 }
 0x392   : > { %v596_v18 = vpop.xlane.xlu0 %595 }
 0x399   : > { %v532_v6 = vpop.f32.mrf.mxu3 }
 0x39a   : > { %537 = vrot.lane.b32.xlu0 %v532_v6, %s909_s30 }
 0x39c   : > { %498 = vadd.xlane.f32.xlu2 %v497_v7 }
 0x3a1   : > { %v534_v8 = vpop.f32.mrf.mxu3 }
 0x3a3   : > { %v629_v9 = vpop.f32.mrf.mxu2 }
 0x3ab   : > { %v631_v10 = vpop.f32.mrf.mxu2 }
 0x3b4   : > { %634 = vrot.lane.b32.xlu2 %v629_v9, %s910_s4 }
 0x3cd   : > { %v441_v16 = vpop.permute.xlu2 %440 }
 0x3ce   : > { %v443_v17 = vadd.f32 %v441_v16, %v413_v15 }
 0x3d0   : > { %445 = vst.msk [vmem:[#allocation4] sm:$0xff] %vm444_vm8, %v443_v17 }
 0x3d7   : > { %v504_v19 = vld [vmem:[#allocation4] sm:$0xff] }
 0x3d8   : > { %v510_v22 = vmul.f32 %v508_v21, %v504_v19 }
 0x40c   : > { %v538_v26 = vpop.permute.xlu0 %537 }
 0x40d   : > { %v540_v27 = vadd.f32 %v538_v26, %v510_v22 }
 0x40f   : > { %542 = vst.msk [vmem:[#allocation4] sm:$0xff] %vm541_vm9, %v540_v27  ;;  %v499_v20 = vpop.xlane.xlu2 %498 }
 0x410   : > { %v500_v24 = vadd.f32 %v499_v20, %v496_v28 }
 0x412   : > { %502 = vst.msk [vmem:[#allocation3] sm:$0xff] %vm501_vm5, %v500_v24 }
 0x416   : > { %v601_v29 = vld [vmem:[#allocation4] sm:$0xff] }
 0x417   : > { %v635_v30 = vpop.permute.xlu2 %634  ;;  %v607_v31 = vmul.f32 %v605_v25, %v601_v29 }
 0x419   : > { %v577_v32 = vld [vmem:[#allocation3] sm:$0xff]  ;;  %v637_v33 = vadd.f32 %v635_v30, %v607_v31 }
 0x41a   : > { %v593_v35 = vmul.f32 %v1057_v38, %v577_v32 }
 0x41b   : > { %639 = vst.msk [vmem:[#allocation4] sm:$0xff] %vm638_vm10, %v637_v33 }
 0x41c   : > { %v597_v36 = vadd.f32 %v596_v18, %v593_v35 }
 0x41e   : > { %599 = vst.msk [vmem:[#allocation3] sm:$0xff] %vm598_vm6, %v597_v36 }
 0x422   : > { %v645_v38 = vld [vmem:[#allocation4] sm:$0xff] }
 0x425   : > { %v643_v34 = vld [vmem:[#allocation3] sm:$0xff] }
 0x426   : > { %873 = vrcp.f32 %v643_v34 }
 0x42c   : > { %v874_v37 = vpop.eup %873 }
 0x42d   : > { %657 = vperm.xlu0 %853, %v874_v37   ;;  %648 = vperm.xlu1 %852, %v874_v37  }
 0x435   : > { %854 = vset.pattern.permute.xlu1 %v906_v2  ;;  %856 = vset.pattern.permute.xlu0 %v907_v3 }
 0x436   : > { %666 = vperm.xlu1 %854, %v874_v37  }
 0x43e   : > { %855 = vset.pattern.permute.xlu1 %v907_v3 }
 0x43f   : > { %675 = vperm.xlu1 %855, %v874_v37  }
 0x49f   : > { %v649_v39 = vpop.permute.xlu1 %648  ;;  %v658_v12 = vpop.permute.xlu0 %657 }
 0x4a0   : > { %v651_v40 = vmul.f32 %v649_v39, %v645_v38  ;;  %v660_v41 = vmul.f32 %v658_v12, %v645_v38 }
 0x4a2   : > { %v652_v42 = vpack.c.bf16 %v651_v40, %v651_v40  ;;  %v661_v43 = vpack.c.bf16 %v660_v41, %v660_v41 }
 0x4a4   : > { %654 = vst.msk [vmem:[%s259_s7] sm:$0xf] %vm653_vm11, %v652_v42 }
 0x4a5   : > { %663 = vst.msk [vmem:[%s259_s7] sm:$0xf] %vm662_vm12, %v661_v43 }
 0x4a8   : > { %v667_v2 = vpop.permute.xlu1 %666 }
 0x4a9   : > { %v669_v44 = vmul.f32 %v667_v2, %v645_v38 }
 0x4ab   : > { %v670_v3 = vpack.c.bf16 %v669_v44, %v669_v44 }
 0x4ad   : > { %672 = vst.msk [vmem:[%s259_s7] sm:$0xf] %vm671_vm13, %v670_v3 }
 0x4b1   : > { %v676_v45 = vpop.permute.xlu1 %675 }
 0x4b2   : > { %v678_v46 = vmul.f32 %v676_v45, %v645_v38 }
 0x4b4   : > { %v679_v47 = vpack.c.bf16 %v678_v46, %v678_v46 }
 0x4b6   : > { %681 = vst.msk [vmem:[%s259_s7] sm:$0xf] %vm680_vm14, %v679_v47 }
 0x4b7 PF: > { %s13_s14 = sadd.s32 1, %s897_s14   ;;  %s1102_s12 = smov %s893_s13 }
 0x4b8   : > { %p10_p5 = scmp.ge.s32.totalorder %s13_s14, 4   ;;  %s1103_s13 = smov %s1105_s15 }
 0x4ba   :  { %12 = sbr.rel (!%p10_p5) target bundleno = 2 (0x2), region = 76 }

// kernel: transformer_forward.33
= control target key start
LH: loop header
LB: loop body
LE: loop exit
PB: predicated region body
PF: predicated region fallthrough
CT: control target
= control target key end

     0   :  { %vm28_vm0 = vcmask 261120   ;;  %v216_v1 = vmov 0.0   ;;  %vm72_vm1 = vcmask 523264   ;;  %v217_v23 = vmov 32.0   ;;  %s299_s1 = inlined_call_operand.vmem [shape: bf16[64,32], index: 1, kind: input, shape index: {}]   ;;  %s300_s0 = inlined_call_operand.vmem [shape: bf16[16,64], index: 0, kind: input, shape index: {}]   ;;  %s301_s2 = inlined_call_operand.vmem [shape: f32[1,32], index: 2, kind: input, shape index: {}]   ;;  %s302_s3 = inlined_call_operand.vmem [shape: f32[16,32], index: 3, kind: input, shape index: {}]   ;;  %s303_s4 = inlined_call_operand.vmem [shape: f32[1,32], index: 4, kind: input, shape index: {}]   ;;  %s304_s5 = inlined_call_operand.vmem [shape: f32[1,32], index: 5, kind: input, shape index: {}]   ;;  %s305_s6 = inlined_call_operand.vmem [shape: f32[16,32], index: 6, kind: output, shape index: {}]  }
   0x1   :  { %v204_v0 = vld [vmem:[%s299_s1 + $0x18] sm:$0xff]  ;;  %29 = vst.msk [vmem:[#allocation2] sm:$0xff] %vm28_vm0, %v216_v1  ;;  %v203_v2 = vld [vmem:[%s299_s1 + $0x10] sm:$0xff]  ;;  %v202_v3 = vld [vmem:[%s299_s1 + $0x8] sm:$0xff]  ;;  %210 = vrcp.f32 %v217_v23 }
   0x2   :  { %30 = vst.msk [vmem:[#allocation2 + $0x8] sm:$0xff] %vm28_vm0, %v216_v1  ;;  %80 = vmatpush.bf16.msra.mxu0 %v204_v0  ;;  %v201_v4 = vld [vmem:[%s299_s1] sm:$0xff]  ;;  %v107_v19 = vld [vmem:[%s302_s3 + $0x8] sm:$0xff] }
   0x3   :  { %v200_v5 = vld [vmem:[%s300_s0] sm:$0xff] }
   0x4   :  { %v207_v10 = vld [vmem:[%s301_s2] ss:$0 sm:$0xff] }
   0x5   :  { %v106_v14 = vld [vmem:[%s302_s3] sm:$0xff] }
   0x6   :  { %81 = vmatpush.bf16.msra.mxu0 %v203_v2  ;;  %v208_v54 = vld [vmem:[%s303_s4] ss:$0 sm:$0xff] }
   0x7   :  { %v211_v24 = vpop.eup %210  ;;  %v209_v57 = vld [vmem:[%s304_s5] ss:$0 sm:$0xff] }
   0x8   :  { %v31_v6 = vld [vmem:[#allocation2] sm:$0xff]  ;;  %v117_v25 = vmul.f32 32.0, %v211_v24  ;;  %vm121_vm2 = vweird.f32 %v211_v24 }
   0x9   :  { %v32_v9 = vld [vmem:[#allocation2 + $0x8] sm:$0xff] }
   0xa   :  { %82 = vmatpush.bf16.msra.mxu0 %v202_v3  ;;  %v118_v26 = vsub.f32 1.0, %v117_v25 }
   0xc   :  { %v119_v27 = vmul.f32 %v211_v24, %v118_v26 }
   0xe   :  { %83 = vmatpush.bf16.msra.mxu0 %v201_v4  ;;  %v120_v28 = vadd.f32 %v211_v24, %v119_v27 }
  0x10   :  { %v122_v29 = vsel %vm121_vm2, %v211_v24, %v120_v28 }
  0x11   :  { %199 = vmatmul.msk.bf16.vlgmr.msra.gmra.mxu0 %vm72_vm1, %v200_v5 }
  0x8e   :  { %v85_v7 = vpop.f32.mrf.mxu0 }
  0x8f   :  { %v90_v8 = vadd.f32 %v85_v7, %v31_v6 }
  0x91   :  { %93 = vst.msk [vmem:[#allocation2] sm:$0xff] %vm28_vm0, %v90_v8 }
  0x96   :  { %v87_v11 = vpop.f32.mrf.mxu0 }
  0x97   :  { %v91_v12 = vadd.f32 %v87_v11, %v32_v9 }
  0x98   :  { %v98_v13 = vld [vmem:[#allocation2] sm:$0xff] }
  0x99   :  { %94 = vst.msk [vmem:[#allocation2 + $0x8] sm:$0xff] %vm28_vm0, %v91_v12  ;;  %v104_v15 = vadd.f32 %v207_v10, %v98_v13 }
  0x9b   :  { %v108_v16 = vadd.f32 %v106_v14, %v104_v15 }
  0x9d   :  { %v110_v17 = vsel %vm28_vm0, %v108_v16, 0.0 }
  0x9e   :  { %111 = vadd.xlane.f32.xlu0 %v110_v17 }
  0xa0   :  { %v99_v18 = vld [vmem:[#allocation2 + $0x8] sm:$0xff] }
  0xa1   :  { %v105_v20 = vadd.f32 %v207_v10, %v99_v18 }
  0xa3   :  { %v109_v21 = vadd.f32 %v107_v19, %v105_v20 }
  0xa5   :  { %v113_v22 = vsel %vm28_vm0, %v109_v21, 0.0 }
  0xa6   :  { %114 = vadd.xlane.f32.xlu0 %v113_v22 }
 0x111   :  { %v112_v30 = vpop.xlane.xlu0 %111 }
 0x112   :  { %v123_v31 = vmul.f32 %v122_v29, %v112_v30 }
 0x114   :  { %v125_v32 = vsub.f32 %v108_v16, %v123_v31 }
 0x116   :  { %v127_v33 = vmul.f32 %v125_v32, %v125_v32 }
 0x118   :  { %v129_v34 = vsel %vm28_vm0, %v127_v33, 0.0 }
 0x119   :  { %130 = vadd.xlane.f32.xlu1 %v129_v34  ;;  %v115_v35 = vpop.xlane.xlu0 %114 }
 0x11a   :  { %v124_v36 = vmul.f32 %v122_v29, %v115_v35 }
 0x11c   :  { %v126_v37 = vsub.f32 %v109_v21, %v124_v36 }
 0x11e   :  { %v128_v38 = vmul.f32 %v126_v37, %v126_v37 }
 0x120   :  { %v132_v39 = vsel %vm28_vm0, %v128_v38, 0.0 }
 0x121   :  { %133 = vadd.xlane.f32.xlu1 %v132_v39 }
 0x18c   :  { %v131_v40 = vpop.xlane.xlu1 %130 }
 0x18d   :  { %v135_v41 = vmul.f32 %v131_v40, %v122_v29 }
 0x18f   :  { %v137_v42 = vadd.f32 1e-05, %v135_v41 }
 0x191   :  { %212 = vrsqrt.f32 %v137_v42  ;;  %vm145_vm4 = vweird.f32 %v137_v42 }
 0x194   :  { %v134_v43 = vpop.xlane.xlu1 %133 }
 0x195   :  { %v136_v44 = vmul.f32 %v134_v43, %v122_v29 }
 0x197   :  { %v213_v45 = vpop.eup %212  ;;  %v138_v46 = vadd.f32 1e-05, %v136_v44 }
 0x198   :  { %v140_v47 = vmul.f32 %v213_v45, %v137_v42  ;;  %vm146_vm3 = vweird.f32 %v213_v45 }
 0x199   :  { %214 = vrsqrt.f32 %v138_v46  ;;  %vm147_vm5 = vmor %vm145_vm4, %vm146_vm3  ;;  %vm155_vm7 = vweird.f32 %v138_v46 }
 0x19a   :  { %v141_v48 = vmul.f32 %v213_v45, %v140_v47 }
 0x19c   :  { %v142_v49 = vmul.f32 0.5, %v141_v48 }
 0x19e   :  { %v143_v50 = vsub.f32 1.5, %v142_v49 }
 0x19f   :  { %v215_v51 = vpop.eup %214 }
 0x1a0   :  { %v144_v52 = vmul.f32 %v213_v45, %v143_v50  ;;  %v150_v53 = vmul.f32 %v215_v51, %v138_v46  ;;  %vm156_vm6 = vweird.f32 %v215_v51 }
 0x1a1   :  { %vm157_vm8 = vmor %vm155_vm7, %vm156_vm6 }
 0x1a2   :  { %v148_v55 = vsel %vm147_vm5, %v213_v45, %v144_v52  ;;  %v151_v56 = vmul.f32 %v215_v51, %v150_v53 }
 0x1a3   :  { %v159_v58 = vmul.f32 %v148_v55, %v125_v32 }
 0x1a4   :  { %v152_v59 = vmul.f32 0.5, %v151_v56 }
 0x1a5   :  { %v165_v60 = vmul.f32 %v208_v54, %v159_v58 }
 0x1a6   :  { %v153_v61 = vsub.f32 1.5, %v152_v59 }
 0x1a7   :  { %v171_v62 = vadd.f32 %v209_v57, %v165_v60 }
 0x1a8   :  { %v154_v63 = vmul.f32 %v215_v51, %v153_v61 }
 0x1a9   :  { %173 = vst.msk [vmem:[%s305_s6] sm:$0xff] %vm28_vm0, %v171_v62 }
 0x1aa   :  { %v158_v0 = vsel %vm157_vm8, %v215_v51, %v154_v63 }
 0x1ab   :  { %v160_v1 = vmul.f32 %v158_v0, %v126_v37 }
 0x1ad   :  { %v166_v2 = vmul.f32 %v208_v54, %v160_v1 }
 0x1af   :  { %v172_v3 = vadd.f32 %v209_v57, %v166_v2 }
 0x1b1   :  { %174 = vst.msk [vmem:[%s305_s6 + $0x8] sm:$0xff] %vm28_vm0, %v172_v3 }

// kernel: transformer_forward.43
= control target key start
LH: loop header
LB: loop body
LE: loop exit
PB: predicated region body
PF: predicated region fallthrough
CT: control target
= control target key end

     0   :  { %vm19_vm0 = vcmask 523264   ;;  %v99_v1 = vmov 0.0   ;;  %vm43_vm1 = vcmask 261120   ;;  %vm79_vm2 = vcmask 519168   ;;  %s145_s1 = inlined_call_operand.vmem [shape: bf16[32,64], index: 1, kind: input, shape index: {}]   ;;  %s146_s0 = inlined_call_operand.vmem [shape: f32[16,32], index: 0, kind: input, shape index: {}]   ;;  %s147_s2 = inlined_call_operand.vmem [shape: f32[1,64], index: 2, kind: input, shape index: {}]   ;;  %s148_s3 = inlined_call_operand.vmem [shape: bf16[16,64], index: 3, kind: output, shape index: {}]  }
   0x1   :  { %v96_v0 = vld [vmem:[%s145_s1 + $0x8] sm:$0xff]  ;;  %20 = vst.msk [vmem:[#allocation2] sm:$0xff] %vm19_vm0, %v99_v1  ;;  %v95_v2 = vld [vmem:[%s145_s1] sm:$0xff] }
   0x2   :  { %21 = vst.msk [vmem:[#allocation2 + $0x8] sm:$0xff] %vm19_vm0, %v99_v1  ;;  %53 = vmatpush.bf16.msra.mxu0 %v96_v0  ;;  %v24_v3 = vld [vmem:[%s146_s0] sm:$0xff]  ;;  %v25_v4 = vld [vmem:[%s146_s0 + $0x8] sm:$0xff] }
   0x3   :  { %v26_v5 = vpack.c.bf16 %v25_v4, %v24_v3  ;;  %v98_v10 = vld [vmem:[%s147_s2] ss:$0 sm:$0xff] }
   0x6   :  { %54 = vmatpush.bf16.msra.mxu0 %v95_v2 }
   0x8   :  { %v22_v6 = vld [vmem:[#allocation2] sm:$0xff] }
   0x9   :  { %94 = vmatmul.msk.bf16.vlgmr.msra.gmra.mxu0 %vm43_vm1, %v26_v5  ;;  %v23_v9 = vld [vmem:[#allocation2 + $0x8] sm:$0xff] }
  0x86   :  { %v56_v7 = vpop.f32.mrf.mxu0 }
  0x87   :  { %v61_v8 = vadd.f32 %v56_v7, %v22_v6 }
  0x89   :  { %64 = vst.msk [vmem:[#allocation2] sm:$0xff] %vm19_vm0, %v61_v8 }
  0x8e   :  { %v58_v11 = vpop.f32.mrf.mxu0 }
  0x8f   :  { %v62_v12 = vadd.f32 %v58_v11, %v23_v9 }
  0x90   :  { %v69_v13 = vld [vmem:[#allocation2] sm:$0xff] }
  0x91   :  { %v75_v14 = vadd.f32 %v98_v10, %v69_v13  ;;  %65 = vst.msk [vmem:[#allocation2 + $0x8] sm:$0xff] %vm19_vm0, %v62_v12 }
  0x93   :  { %v77_v15 = vpack.c.bf16 %v75_v14, %v75_v14 }
  0x95   :  { %80 = vst.msk [vmem:[%s148_s3] sm:$0xf] %vm79_vm2, %v77_v15 }
  0x98   :  { %v70_v16 = vld [vmem:[#allocation2 + $0x8] sm:$0xff] }
  0x99   :  { %v76_v17 = vadd.f32 %v98_v10, %v70_v16 }
  0x9b   :  { %v78_v18 = vpack.c.bf16 %v76_v17, %v76_v17 }
  0x9d   :  { %81 = vst.msk [vmem:[%s148_s3 + $0x4] sm:$0xf] %vm79_vm2, %v78_v18 }

// kernel: transformer_forward.42
= control target key start
LH: loop header
LB: loop body
LE: loop exit
PB: predicated region body
PF: predicated region fallthrough
CT: control target
= control target key end

     0   :  { %vm19_vm0 = vcmask 261120   ;;  %v98_v1 = vmov 0.0   ;;  %vm78_vm1 = vcmask 257024   ;;  %s145_s1 = inlined_call_operand.vmem [shape: bf16[32,32], index: 1, kind: input, shape index: {}]   ;;  %s146_s0 = inlined_call_operand.vmem [shape: f32[16,32], index: 0, kind: input, shape index: {}]   ;;  %s147_s2 = inlined_call_operand.vmem [shape: f32[1,32], index: 2, kind: input, shape index: {}]   ;;  %s148_s3 = inlined_call_operand.vmem [shape: bf16[16,32], index: 3, kind: output, shape index: {}]  }
   0x1   :  { %v95_v0 = vld [vmem:[%s145_s1 + $0x8] sm:$0xff]  ;;  %20 = vst.msk [vmem:[#allocation2] sm:$0xff] %vm19_vm0, %v98_v1  ;;  %v94_v2 = vld [vmem:[%s145_s1] sm:$0xff] }
   0x2   :  { %21 = vst.msk [vmem:[#allocation2 + $0x8] sm:$0xff] %vm19_vm0, %v98_v1  ;;  %53 = vmatpush.bf16.msra.mxu0 %v95_v0  ;;  %v24_v3 = vld [vmem:[%s146_s0] sm:$0xff]  ;;  %v25_v4 = vld [vmem:[%s146_s0 + $0x8] sm:$0xff] }
   0x3   :  { %v26_v5 = vpack.c.bf16 %v25_v4, %v24_v3  ;;  %v97_v10 = vld [vmem:[%s147_s2] ss:$0 sm:$0xff] }
   0x6   :  { %54 = vmatpush.bf16.msra.mxu0 %v94_v2 }
   0x8   :  { %v22_v6 = vld [vmem:[#allocation2] sm:$0xff] }
   0x9   :  { %93 = vmatmul.msk.bf16.vlgmr.msra.gmra.mxu0 %vm19_vm0, %v26_v5  ;;  %v23_v9 = vld [vmem:[#allocation2 + $0x8] sm:$0xff] }
  0x86   :  { %v56_v7 = vpop.f32.mrf.mxu0 }
  0x87   :  { %v61_v8 = vadd.f32 %v56_v7, %v22_v6 }
  0x89   :  { %63 = vst.msk [vmem:[#allocation2] sm:$0xff] %vm19_vm0, %v61_v8 }
  0x8e   :  { %v58_v11 = vpop.f32.mrf.mxu0 }
  0x8f   :  { %v62_v12 = vadd.f32 %v58_v11, %v23_v9 }
  0x90   :  { %v68_v13 = vld [vmem:[#allocation2] sm:$0xff] }
  0x91   :  { %v74_v14 = vadd.f32 %v97_v10, %v68_v13  ;;  %64 = vst.msk [vmem:[#allocation2 + $0x8] sm:$0xff] %vm19_vm0, %v62_v12 }
  0x93   :  { %v76_v15 = vpack.c.bf16 %v74_v14, %v74_v14 }
  0x95   :  { %79 = vst.msk [vmem:[%s148_s3] sm:$0xf] %vm78_vm1, %v76_v15 }
  0x98   :  { %v69_v16 = vld [vmem:[#allocation2 + $0x8] sm:$0xff] }
  0x99   :  { %v75_v17 = vadd.f32 %v97_v10, %v69_v16 }
  0x9b   :  { %v77_v18 = vpack.c.bf16 %v75_v17, %v75_v17 }
  0x9d   :  { %80 = vst.msk [vmem:[%s148_s3 + $0x4] sm:$0xf] %vm78_vm1, %v77_v18 }

// kernel: transformer_forward.57
= control target key start
LH: loop header
LB: loop body
LE: loop exit
PB: predicated region body
PF: predicated region fallthrough
CT: control target
= control target key end

     0   :  { %vm20_vm0 = vcmask 523264   ;;  %v140_v1 = vmov 0.0   ;;  %s188_s0 = inlined_call_operand.vmem [shape: f32[16,32], index: 0, kind: input, shape index: {}]   ;;  %s189_s1 = inlined_call_operand.vmem [shape: bf16[32,64], index: 1, kind: input, shape index: {}]   ;;  %s190_s2 = inlined_call_operand.vmem [shape: f32[1,64], index: 2, kind: input, shape index: {}]   ;;  %s191_s3 = inlined_call_operand.hbm [shape: f32[16,64], index: 3, kind: output, shape index: {}]  }
   0x1   :  { %v108_v0 = vld [vmem:[%s189_s1 + $0x8] sm:$0xff]  ;;  %21 = vst.msk [vmem:[#allocation2] sm:$0xff] %vm20_vm0, %v140_v1 }
   0x2   :  { %8 = vsyncpa [#allocation4], 0  ;;  %54 = vmatpush.bf16.msra.mxu0 %v108_v0  ;;  %v107_v2 = vld [vmem:[%s189_s1] sm:$0xff]  ;;  %v26_v4 = vld [vmem:[%s188_s0 + $0x8] sm:$0xff]  ;;  %22 = vst.msk [vmem:[#allocation2 + $0x8] sm:$0xff] %vm20_vm0, %v140_v1  ;;  %vm44_vm1 = vcmask 261120  }
   0x3   :  { %v25_v3 = vld [vmem:[%s188_s0] sm:$0xff]  ;;  %s141_s0 = smov [#allocation3]   ;;  %s86_s24 = sshll.u32 %s191_s3, 4  ;;  %s87_s24 = int_to_ptr.hbm [resolvable:$true] %s86_s24 }
   0x4   :  { %v27_v5 = vpack.c.bf16 %v26_v4, %v25_v3  ;;  %v113_v10 = vld [vmem:[%s190_s2] ss:$0 sm:$0xff]  ;;  %s84_s21 = sshll.u32 %s141_s0, 4  ;;  %s142_s2 = smov 128   ;;  %s85_s21 = int_to_ptr.vmem [resolvable:$true] %s84_s21 }
   0x5   :  { %s143_s25 = smov 8  }
   0x6   :  { %55 = vmatpush.bf16.msra.mxu0 %v107_v2 }
   0x8   :  { %v23_v6 = vld [vmem:[#allocation2] sm:$0xff] }
   0x9   :  { %106 = vmatmul.msk.bf16.vlgmr.msra.gmra.mxu0 %vm44_vm1, %v27_v5  ;;  %v24_v9 = vld [vmem:[#allocation2 + $0x8] sm:$0xff] }
  0x86   :  { %v57_v7 = vpop.f32.mrf.mxu0 }
  0x87   :  { %v62_v8 = vadd.f32 %v57_v7, %v23_v6 }
  0x89   :  { %65 = vst.msk [vmem:[#allocation2] sm:$0xff] %vm20_vm0, %v62_v8 }
  0x8e   :  { %v59_v11 = vpop.f32.mrf.mxu0 }
  0x8f   :  { %v63_v12 = vadd.f32 %v59_v11, %v24_v9 }
  0x90   :  { %v70_v13 = vld [vmem:[#allocation2] sm:$0xff] }
  0x91   :  { %66 = vst.msk [vmem:[#allocation2 + $0x8] sm:$0xff] %vm20_vm0, %v63_v12  ;;  %v76_v14 = vadd.f32 %v113_v10, %v70_v13 }
  0x93   :  { %78 = vst.msk [vmem:[#allocation3] sm:$0xff] %vm20_vm0, %v76_v14 }
  0x98   :  { %v71_v15 = vld [vmem:[#allocation2 + $0x8] sm:$0xff] }
  0x99   :  { %v77_v16 = vadd.f32 %v113_v10, %v71_v15 }
  0x9b   :  { %79 = vst.msk [vmem:[#allocation3 + $0x8] sm:$0xff] %vm20_vm0, %v77_v16 }
  0x9c   :  { %92 = dma.vmem_to_hbm [thread:$0]  %s85_s21, 256, %s87_s24, [#allocation4], %s142_s2, %s142_s2, %s143_s25  }
  0x9d   :  { %138 = dma.done.wait [#allocation4], 256  }
  0x9e   :  { %139 = vsyncadd [#allocation4], 4294967040 }
  0x9f   :  { %97 = vsyncpa [#allocation4], 1 }

</bundles_post_ra>
